<compile_context>
chip_gen: v6e
topology: v6e:2x2x1
jax: 0.10.0
libtpu: 0.0.40
codegen_flags: <defaults>
</compile_context>

<pallas_src>
import functools

import jax
import jax.numpy as jnp
from jax.experimental import pallas as pl
from jax.experimental.pallas import tpu as pltpu


def _erf_f32(x):
    # Abramowitz & Stegun 7.1.26 polynomial (|abs err| < 1.5e-7): matches torch.erf (nn.GELU's
    # exact/erf form) using only VPU/EUP-friendly ops. The divide runs on the EUP slot.
    p = 0.3275911
    a1, a2, a3, a4, a5 = 0.254829592, -0.284496736, 1.421413741, -1.453152027, 1.061405429
    ax = jnp.abs(x)
    t = pl.reciprocal(1.0 + p * ax, approx=True)
    poly = ((((a5 * t + a4) * t + a3) * t + a2) * t + a1) * t
    y = 1.0 - poly * jnp.exp(-ax * ax)
    return jnp.where(x >= 0.0, y, -y)


def _gelu_exact(x):
    return 0.5 * x * (1.0 + _erf_f32(x * 0.7071067811865476))


def _layer_norm(x, w, b, eps=1e-5):
    mu = jnp.mean(x, axis=-1, keepdims=True)
    var = jnp.mean(jnp.square(x - mu), axis=-1, keepdims=True)   # biased var, like nn.LayerNorm
    return (x - mu) * jax.lax.rsqrt(var + eps) * w + b


def transformer_layer_kernel(x_ref, wp_ref, bp_ref,
                             wqkv_ref, bqkv_ref, wao_ref, bao_ref,
                             ln1w_ref, ln1b_ref, ln2w_ref, ln2b_ref,
                             w1_ref, b1_ref, w2_ref, b2_ref,
                             wo_ref, bo_ref,
                             out_ref, h_ref, *, n_heads):
    l = pl.program_id(1)
    n_layers = pl.num_programs(1)

    bt, seq, din = x_ref.shape
    hidden = wp_ref.shape[1]
    head_dim = hidden // n_heads
    rows = bt * seq
    mxu_dtype = wp_ref.dtype          # bf16 by default; f32 if params were built in f32

    # ---- l == 0: input projection initializes the resident activation accumulator ----
    @pl.when(l == 0)
    def _():
        x2 = x_ref[...].reshape(rows, din)        # already in mxu_dtype (cast in the wrapper)
        h_ref[...] = (jnp.dot(x2, wp_ref[...], preferred_element_type=jnp.float32)
                      + bp_ref[...])

    h = h_ref[...]                                # (rows, H), f32
    hc = h.astype(mxu_dtype)

    # ---- multi-head self-attention (batch_first; 1/sqrt(head_dim) folded into Q weights) ----
    qkv = jnp.dot(hc, wqkv_ref[0], preferred_element_type=jnp.float32) + bqkv_ref[0]  # (rows, 3H) f32
    qkv = qkv.astype(mxu_dtype).reshape(bt, seq, 3 * hidden)   # single cast; slices below are bf16

    # Static loop over heads (small fixed trip count): single-batch 3-D einsums per head,
    # head outputs concatenated once (bf16) so out_proj is a single K=H matmul.
    head_outs = []
    for hd_i in range(n_heads):
        lo = hd_i * head_dim
        qh = qkv[:, :, lo:lo + head_dim]
        kh = qkv[:, :, hidden + lo:hidden + lo + head_dim]
        vh = qkv[:, :, 2 * hidden + lo:2 * hidden + lo + head_dim]
        s = jnp.einsum('bqd,bkd->bqk', qh, kh,
                       preferred_element_type=jnp.float32)            # (bt, S, S), f32
        m = jnp.max(s, axis=-1, keepdims=True)
        e = jnp.exp(s - m)
        p = e * pl.reciprocal(jnp.sum(e, axis=-1, keepdims=True), approx=True)
        head_outs.append(
            jnp.einsum('bqk,bkd->bqd', p.astype(mxu_dtype), vh,
                       preferred_element_type=jnp.float32).astype(mxu_dtype))  # (bt, S, hd)
    ctx = jnp.concatenate(head_outs, axis=-1).reshape(rows, hidden)
    attn = (jnp.dot(ctx, wao_ref[0], preferred_element_type=jnp.float32)
            + bao_ref[0])                                              # single (H,H) out_proj

    h = _layer_norm(h + attn, ln1w_ref[0], ln1b_ref[0])

    # ---- feed-forward: Linear(H,4H) -> GELU(exact erf) -> Linear(4H,H) ----
    ff = jnp.dot(h.astype(mxu_dtype), w1_ref[0], preferred_element_type=jnp.float32) + b1_ref[0]
    ff = _gelu_exact(ff)
    ff = jnp.dot(ff.astype(mxu_dtype), w2_ref[0], preferred_element_type=jnp.float32) + b2_ref[0]

    h = _layer_norm(h + ff, ln2w_ref[0], ln2b_ref[0])
    h_ref[...] = h

    # ---- l == L-1: mean pool over seq, output Linear(H,1), sigmoid, lane-dense store ----
    @pl.when(l == n_layers - 1)
    def _():
        pooled = jnp.mean(h.reshape(bt, seq, hidden), axis=1)             # (bt, H)
        logit = jax.lax.dot_general(wo_ref[...], pooled,
                                    (((1,), (1,)), ((), ())),
                                    preferred_element_type=jnp.float32) + bo_ref[...]   # (1, bt)
        out_ref[0] = jax.nn.sigmoid(logit)


def init_params(key, input_dim, hidden_dim, n_layers, n_heads, param_dtype=jnp.bfloat16):
    """Deterministic synthetic parameters. Matmul weights are stored pre-transposed ([in, out])
    in `param_dtype` (bf16 by default for MXU throughput / half the weight DMA); biases,
    LayerNorm params and the output head stay in f32. The attention 1/sqrt(head_dim) scale is
    pre-folded into the Q projection weights and bias."""
    H, L = hidden_dim, n_layers
    head_dim = H // n_heads
    scale = 1.0 / (head_dim ** 0.5)
    ks = jax.random.split(key, 16)

    def norm(k, shape, s=0.02):
        return s * jax.random.normal(k, shape, dtype=jnp.float32)

    wqkv = norm(ks[2], (L, H, 3 * H))
    bqkv = norm(ks[3], (L, 1, 3 * H))
    wqkv = wqkv.at[:, :, :H].multiply(scale)    # fold q-scaling into weights (f32, pre-cast)
    bqkv = bqkv.at[:, :, :H].multiply(scale)

    return dict(
        wp_t=norm(ks[0], (input_dim, H)).astype(param_dtype),   # input_proj.weight.T
        bp=norm(ks[1], (1, H)),                                 # input_proj.bias
        wqkv_t=wqkv.astype(param_dtype),                        # MHA in_proj_weight.T  [q | k | v]
        bqkv=bqkv,                                              # MHA in_proj_bias
        wao_t=norm(ks[4], (L, H, H)).astype(param_dtype),       # MHA out_proj.weight.T
        bao=norm(ks[5], (L, 1, H)),                             # MHA out_proj.bias
        ln1w=1.0 + norm(ks[6], (L, 1, H)),                      # post-attention LayerNorm
        ln1b=norm(ks[7], (L, 1, H)),
        ln2w=1.0 + norm(ks[8], (L, 1, H)),                      # post-FF LayerNorm
        ln2b=norm(ks[9], (L, 1, H)),
        w1_t=norm(ks[10], (L, H, 4 * H)).astype(param_dtype),   # ff Linear1 weight.T
        b1=norm(ks[11], (L, 1, 4 * H)),
        w2_t=norm(ks[12], (L, 4 * H, H)).astype(param_dtype),   # ff Linear2 weight.T
        b2=norm(ks[13], (L, 1, H)),
        wo=norm(ks[14], (1, H)),                                # output.weight (f32, tiny)
        bo=norm(ks[15], (1, 1)),                                # output.bias
    )


def _tpu_hw_defaults():
    """(mxu_row_granule, physical_vmem_bytes) with conservative fallbacks."""
    granule, vmem_phys = 256, 64 * 1024 * 1024        # conservative default (v7x-sized VMEM)
    try:
        kind = jax.devices()[0].device_kind.lower()
    except Exception:
        kind = ""
    if any(v in kind for v in ("v2", "v3", "v4", "v5")):
        granule = 128                                  # 128-wide MXU generations
    if any(v in kind for v in ("v4", "v5", "v6")):
        vmem_phys = 128 * 1024 * 1024                  # 128 MiB parts
    try:
        vmem_phys = int(pltpu.get_tpu_info().vmem_capacity_bytes)
    except Exception:
        pass
    return granule, vmem_phys


def _vmem_limit_bytes(params, x_itemsize, bt, seq, hidden, din, n_layers, vmem_phys):
    def nbytes(a):
        return int(a.size) * a.dtype.itemsize

    streamed = ["wqkv_t", "bqkv", "wao_t", "bao", "ln1w", "ln1b", "ln2w", "ln2b",
                "w1_t", "b1", "w2_t", "b2"]
    per_layer = sum(nbytes(params[k]) for k in streamed) // n_layers
    resident = sum(nbytes(params[k]) for k in ["wp_t", "bp", "wo", "bo"])
    rows = bt * seq
    wdt = params["wp_t"].dtype.itemsize
    x_tile = rows * din * x_itemsize
    h_scratch = rows * hidden * 4
    # Live activation temporaries: h + cast copy, qkv f32 + cast, head_outs/ctx + attn + residual,
    # FF pre/post-GELU + cast, plus one head's scores/exp/probs (+ bf16 prob copy).
    acts = rows * (hidden * (4 + wdt)
                   + 3 * hidden * (4 + wdt)
                   + hidden * (wdt + 4 + 4)
                   + 4 * hidden * (4 + wdt + 4))
    acts += bt * seq * seq * (3 * 4 + wdt)
    est = 2 * per_layer + resident + 2 * x_tile + h_scratch + acts
    cap = int(vmem_phys * 0.82)          # ~52 MiB on v7x (64 MiB), ~105 MiB on v5e/v6e (128 MiB)
    return int(min(cap, max(32 * 1024 * 1024, 2 * est)))


def large_transformer_forward(x, params, *, n_layers, n_heads, batch_tile=None):
    B, S, Din = x.shape
    H = params["wp_t"].shape[1]
    assert H % n_heads == 0

    granule, vmem_phys = _tpu_hw_defaults()

    # Fold a batch tile into the matmul M dimension (M = Bt*S). Prefer the largest divisor of B
    # whose fused M is a multiple of the MXU row granule (128 on v2-v5, 256 on v6e/v7x); cap M
    # by a generation-aware bound so activations fit VMEM.
    if batch_tile is None:
        m_cap = 1024 if vmem_phys > (96 << 20) else 512
        divisors = [d for d in range(1, B + 1) if B % d == 0 and d * S <= m_cap]
        aligned = [d for d in divisors if (d * S) % granule == 0]
        batch_tile = max(aligned) if aligned else (max(divisors) if divisors else 1)
    bt = batch_tile
    assert B % bt == 0
    n_b_tiles = B // bt

    # Pre-cast the input to the MXU dtype in the wrapper: halves the x DMA per batch tile and
    # removes the in-kernel cast pass.
    mxu_dtype = params["wp_t"].dtype
    x = x.astype(mxu_dtype)

    order = ["wp_t", "bp", "wqkv_t", "bqkv", "wao_t", "bao",
             "ln1w", "ln1b", "ln2w", "ln2b", "w1_t", "b1", "w2_t", "b2", "wo", "bo"]
    weights = [params[k] for k in order]
    resident_keys = {"wp_t", "bp", "wo", "bo"}          # tiny; kept resident across the grid

    def resident_spec(a):
        nd = a.ndim
        return pl.BlockSpec(a.shape, lambda b, l, _nd=nd: (0,) * _nd)

    def layer_spec(a):
        # stream one layer's slice per grid step along the (innermost) layer axis
        nz = a.ndim - 1
        return pl.BlockSpec((1,) + a.shape[1:], lambda b, l, _nz=nz: (l,) + (0,) * _nz)

    in_specs = [pl.BlockSpec((bt, S, Din), lambda b, l: (b, 0, 0))]
    for k, a in zip(order, weights):
        in_specs.append(resident_spec(a) if k in resident_keys else layer_spec(a))

    out_specs = pl.BlockSpec((1, 1, bt), lambda b, l: (b, 0, 0))

    kernel = functools.partial(transformer_layer_kernel, n_heads=n_heads)
    out = pl.pallas_call(
        kernel,
        out_shape=jax.ShapeDtypeStruct((n_b_tiles, 1, bt), jnp.float32),
        grid=(n_b_tiles, n_layers),                       # batch tiles (parallel) x layers (arbitrary)
        in_specs=in_specs,
        out_specs=out_specs,
        scratch_shapes=[pltpu.VMEM((bt * S, H), jnp.float32)],   # resident activation accumulator
        compiler_params=pltpu.CompilerParams(
            dimension_semantics=("parallel", "arbitrary"),
            vmem_limit_bytes=_vmem_limit_bytes(params, x.dtype.itemsize, bt, S, H, Din,
                                               n_layers, vmem_phys),
        ),
    )(x, *weights)

    # torch: sigmoid(output(x.mean(dim=1))).squeeze() -> (B,) for B > 1, scalar for B == 1
    return jnp.squeeze(out.reshape(B))


if __name__ == "__main__":
    B, S, Din = 2, 8, 16          # batch, seq, input_dim
    H, L, NH = 32, 2, 4           # hidden_dim, n_layers, n_heads (H % NH == 0)

    key = jax.random.PRNGKey(0)
    kx, kp = jax.random.split(key)
    x = jax.random.normal(kx, (B, S, Din), dtype=jnp.float32)
    params = init_params(kp, Din, H, L, NH)

    y = large_transformer_forward(x, params, n_layers=L, n_heads=NH)
    jax.block_until_ready(y)
    assert y.shape == (B,), y.shape
    assert bool(jnp.all(jnp.isfinite(y)))
    print("KERNEL_OK")
</pallas_src>

<mosaic_0001>
module attributes {stable_mosaic.version = 11 : i64} {
  func.func @transformer_layer_kernel(%arg0: i32, %arg1: i32, %arg2: memref<2x8x16xbf16, #tpu.memory_space<vmem>>, %arg3: memref<16x32xbf16, #tpu.memory_space<vmem>>, %arg4: memref<1x32xf32, #tpu.memory_space<vmem>>, %arg5: memref<1x32x96xbf16, #tpu.memory_space<vmem>>, %arg6: memref<1x1x96xf32, #tpu.memory_space<vmem>>, %arg7: memref<1x32x32xbf16, #tpu.memory_space<vmem>>, %arg8: memref<1x1x32xf32, #tpu.memory_space<vmem>>, %arg9: memref<1x1x32xf32, #tpu.memory_space<vmem>>, %arg10: memref<1x1x32xf32, #tpu.memory_space<vmem>>, %arg11: memref<1x1x32xf32, #tpu.memory_space<vmem>>, %arg12: memref<1x1x32xf32, #tpu.memory_space<vmem>>, %arg13: memref<1x32x128xbf16, #tpu.memory_space<vmem>>, %arg14: memref<1x1x128xf32, #tpu.memory_space<vmem>>, %arg15: memref<1x128x32xbf16, #tpu.memory_space<vmem>>, %arg16: memref<1x1x32xf32, #tpu.memory_space<vmem>>, %arg17: memref<1x32xf32, #tpu.memory_space<vmem>>, %arg18: memref<1x1xf32, #tpu.memory_space<vmem>>, %arg19: memref<1x1x2xf32, #tpu.memory_space<vmem>>, %arg20: memref<16x32xf32, #tpu.memory_space<vmem>>) attributes {dimension_semantics = [#tpu.dimension_semantics<parallel>, #tpu.dimension_semantics<arbitrary>], iteration_bounds = array<i64: 1, 2>, scalar_prefetch = 0 : i64, scratch_operands = 1 : i64, tpu.core_type = #tpu.core_type<tc>, window_params = [{transform_indices = @transform_0, window_bounds = array<i64: 2, 8, 16>}, {pipeline_mode = #tpu.pipeline_mode<synchronous>, transform_indices = @transform_1, window_bounds = array<i64: 16, 32>}, {pipeline_mode = #tpu.pipeline_mode<synchronous>, transform_indices = @transform_2, window_bounds = array<i64: 1, 32>}, {transform_indices = @transform_3, window_bounds = array<i64: 1, 32, 96>}, {transform_indices = @transform_4, window_bounds = array<i64: 1, 1, 96>}, {transform_indices = @transform_5, window_bounds = array<i64: 1, 32, 32>}, {transform_indices = @transform_6, window_bounds = array<i64: 1, 1, 32>}, {transform_indices = @transform_7, window_bounds = array<i64: 1, 1, 32>}, {transform_indices = @transform_8, window_bounds = array<i64: 1, 1, 32>}, {transform_indices = @transform_9, window_bounds = array<i64: 1, 1, 32>}, {transform_indices = @transform_10, window_bounds = array<i64: 1, 1, 32>}, {transform_indices = @transform_11, window_bounds = array<i64: 1, 32, 128>}, {transform_indices = @transform_12, window_bounds = array<i64: 1, 1, 128>}, {transform_indices = @transform_13, window_bounds = array<i64: 1, 128, 32>}, {transform_indices = @transform_14, window_bounds = array<i64: 1, 1, 32>}, {pipeline_mode = #tpu.pipeline_mode<synchronous>, transform_indices = @transform_15, window_bounds = array<i64: 1, 32>}, {pipeline_mode = #tpu.pipeline_mode<synchronous>, transform_indices = @transform_16, window_bounds = array<i64: 1, 1>}, {transform_indices = @transform_17, window_bounds = array<i64: 1, 1, 2>}]} {
    %c0_i32 = arith.constant 0 : i32
    %0 = arith.cmpi eq, %arg1, %c0_i32 : i32
    %1 = arith.extui %0 : i1 to i32
    %c0_i32_0 = arith.constant 0 : i32
    %2 = arith.cmpi ne, %1, %c0_i32_0 : i32
    scf.if %2 {
      %c0_84 = arith.constant 0 : index
      %c0_85 = arith.constant 0 : index
      %c0_86 = arith.constant 0 : index
      %204 = vector.load %arg2[%c0_84, %c0_85, %c0_86] : memref<2x8x16xbf16, #tpu.memory_space<vmem>>, vector<2x8x16xbf16>
      %205 = vector.shape_cast %204 : vector<2x8x16xbf16> to vector<16x16xbf16>
      %c0_87 = arith.constant 0 : index
      %c0_88 = arith.constant 0 : index
      %206 = vector.load %arg3[%c0_87, %c0_88] : memref<16x32xbf16, #tpu.memory_space<vmem>>, vector<16x32xbf16>
      %cst_89 = arith.constant dense<0.000000e+00> : vector<16x32xf32>
      %207 = tpu.matmul %205, %206, %cst_89 {dimension_numbers = #tpu.dot_dimension_numbers<[1], [0], [0], [1], [0, 0, 1, 1], [], []>} : vector<16x16xbf16>, vector<16x32xbf16>, vector<16x32xf32> -> vector<16x32xf32>
      %c0_90 = arith.constant 0 : index
      %c0_91 = arith.constant 0 : index
      %208 = vector.load %arg4[%c0_90, %c0_91] : memref<1x32xf32, #tpu.memory_space<vmem>>, vector<1x32xf32>
      %209 = vector.broadcast %208 : vector<1x32xf32> to vector<16x32xf32>
      %210 = arith.addf %207, %209 : vector<16x32xf32>
      %c0_92 = arith.constant 0 : index
      %c0_93 = arith.constant 0 : index
      %211 = vector.load %arg20[%c0_92, %c0_93] : memref<16x32xf32, #tpu.memory_space<vmem>>, vector<16x32xf32>
      tpu.vector_store %arg20[%c0_92, %c0_93], %210 {strides = array<i32>} : memref<16x32xf32, #tpu.memory_space<vmem>>, vector<16x32xf32>,
    } else {
    }
    %c0 = arith.constant 0 : index
    %c0_1 = arith.constant 0 : index
    %3 = vector.load %arg20[%c0, %c0_1] : memref<16x32xf32, #tpu.memory_space<vmem>>, vector<16x32xf32>
    %4 = arith.truncf %3 : vector<16x32xf32> to vector<16x32xbf16>
    %c0_2 = arith.constant 0 : index
    %c0_3 = arith.constant 0 : index
    %c0_4 = arith.constant 0 : index
    %5 = vector.load %arg5[%c0_2, %c0_3, %c0_4] : memref<1x32x96xbf16, #tpu.memory_space<vmem>>, vector<1x32x96xbf16>
    %6 = vector.shape_cast %5 : vector<1x32x96xbf16> to vector<32x96xbf16>
    %cst = arith.constant dense<0.000000e+00> : vector<16x96xf32>
    %7 = tpu.matmul %4, %6, %cst {dimension_numbers = #tpu.dot_dimension_numbers<[1], [0], [0], [1], [0, 0, 1, 1], [], []>} : vector<16x32xbf16>, vector<32x96xbf16>, vector<16x96xf32> -> vector<16x96xf32>
    %c0_5 = arith.constant 0 : index
    %c0_6 = arith.constant 0 : index
    %c0_7 = arith.constant 0 : index
    %8 = vector.load %arg6[%c0_5, %c0_6, %c0_7] : memref<1x1x96xf32, #tpu.memory_space<vmem>>, vector<1x1x96xf32>
    %9 = vector.shape_cast %8 : vector<1x1x96xf32> to vector<1x96xf32>
    %10 = vector.broadcast %9 : vector<1x96xf32> to vector<16x96xf32>
    %11 = arith.addf %7, %10 : vector<16x96xf32>
    %12 = arith.truncf %11 : vector<16x96xf32> to vector<16x96xbf16>
    %13 = vector.shape_cast %12 : vector<16x96xbf16> to vector<2x8x96xbf16>
    %14 = vector.extract_strided_slice %13 {offsets = [0, 0, 0], sizes = [2, 8, 8], strides = [1, 1, 1]} : vector<2x8x96xbf16> to vector<2x8x8xbf16>
    %15 = vector.extract_strided_slice %13 {offsets = [0, 0, 32], sizes = [2, 8, 8], strides = [1, 1, 1]} : vector<2x8x96xbf16> to vector<2x8x8xbf16>
    %16 = vector.extract_strided_slice %13 {offsets = [0, 0, 64], sizes = [2, 8, 8], strides = [1, 1, 1]} : vector<2x8x96xbf16> to vector<2x8x8xbf16>
    "tpu.trace_start"() <{level = 10 : i32, message = "bqd,bkd->bqk"}> : () -> ()
    %cst_8 = arith.constant dense<0.000000e+00> : vector<2x8x8xf32>
    %17 = tpu.matmul %14, %15, %cst_8 {dimension_numbers = #tpu.dot_dimension_numbers<[2], [2], [1], [1], [0, 0, 0, 1, 1, 1], [0], [0]>} : vector<2x8x8xbf16>, vector<2x8x8xbf16>, vector<2x8x8xf32> -> vector<2x8x8xf32>
    "tpu.trace_stop"() : () -> ()
    %cst_9 = arith.constant dense<0xFF800000> : vector<2x8xf32>
    %18 = vector.multi_reduction <maximumf>, %17, %cst_9 [2] : vector<2x8x8xf32> to vector<2x8xf32>
    %19 = vector.shape_cast %18 : vector<2x8xf32> to vector<2x8x1xf32>
    %20 = vector.broadcast %19 : vector<2x8x1xf32> to vector<2x8x8xf32>
    %21 = arith.subf %17, %20 : vector<2x8x8xf32>
    %22 = math.exp %21 : vector<2x8x8xf32>
    %cst_10 = arith.constant dense<0.000000e+00> : vector<2x8xf32>
    %23 = vector.multi_reduction <add>, %22, %cst_10 [2] : vector<2x8x8xf32> to vector<2x8xf32>
    %24 = vector.shape_cast %23 : vector<2x8xf32> to vector<2x8x1xf32>
    %25 = tpu.reciprocal %24 {approx = true} : vector<2x8x1xf32> -> vector<2x8x1xf32>
    %26 = vector.broadcast %25 : vector<2x8x1xf32> to vector<2x8x8xf32>
    %27 = arith.mulf %22, %26 : vector<2x8x8xf32>
    %28 = arith.truncf %27 : vector<2x8x8xf32> to vector<2x8x8xbf16>
    "tpu.trace_start"() <{level = 10 : i32, message = "bqk,bkd->bqd"}> : () -> ()
    %cst_11 = arith.constant dense<0.000000e+00> : vector<2x8x8xf32>
    %29 = tpu.matmul %28, %16, %cst_11 {dimension_numbers = #tpu.dot_dimension_numbers<[2], [1], [1], [2], [0, 0, 0, 1, 1, 2], [0], [0]>} : vector<2x8x8xbf16>, vector<2x8x8xbf16>, vector<2x8x8xf32> -> vector<2x8x8xf32>
    "tpu.trace_stop"() : () -> ()
    %30 = arith.truncf %29 : vector<2x8x8xf32> to vector<2x8x8xbf16>
    %31 = vector.extract_strided_slice %13 {offsets = [0, 0, 8], sizes = [2, 8, 8], strides = [1, 1, 1]} : vector<2x8x96xbf16> to vector<2x8x8xbf16>
    %32 = vector.extract_strided_slice %13 {offsets = [0, 0, 40], sizes = [2, 8, 8], strides = [1, 1, 1]} : vector<2x8x96xbf16> to vector<2x8x8xbf16>
    %33 = vector.extract_strided_slice %13 {offsets = [0, 0, 72], sizes = [2, 8, 8], strides = [1, 1, 1]} : vector<2x8x96xbf16> to vector<2x8x8xbf16>
    "tpu.trace_start"() <{level = 10 : i32, message = "bqd,bkd->bqk"}> : () -> ()
    %cst_12 = arith.constant dense<0.000000e+00> : vector<2x8x8xf32>
    %34 = tpu.matmul %31, %32, %cst_12 {dimension_numbers = #tpu.dot_dimension_numbers<[2], [2], [1], [1], [0, 0, 0, 1, 1, 1], [0], [0]>} : vector<2x8x8xbf16>, vector<2x8x8xbf16>, vector<2x8x8xf32> -> vector<2x8x8xf32>
    "tpu.trace_stop"() : () -> ()
    %cst_13 = arith.constant dense<0xFF800000> : vector<2x8xf32>
    %35 = vector.multi_reduction <maximumf>, %34, %cst_13 [2] : vector<2x8x8xf32> to vector<2x8xf32>
    %36 = vector.shape_cast %35 : vector<2x8xf32> to vector<2x8x1xf32>
    %37 = vector.broadcast %36 : vector<2x8x1xf32> to vector<2x8x8xf32>
    %38 = arith.subf %34, %37 : vector<2x8x8xf32>
    %39 = math.exp %38 : vector<2x8x8xf32>
    %cst_14 = arith.constant dense<0.000000e+00> : vector<2x8xf32>
    %40 = vector.multi_reduction <add>, %39, %cst_14 [2] : vector<2x8x8xf32> to vector<2x8xf32>
    %41 = vector.shape_cast %40 : vector<2x8xf32> to vector<2x8x1xf32>
    %42 = tpu.reciprocal %41 {approx = true} : vector<2x8x1xf32> -> vector<2x8x1xf32>
    %43 = vector.broadcast %42 : vector<2x8x1xf32> to vector<2x8x8xf32>
    %44 = arith.mulf %39, %43 : vector<2x8x8xf32>
    %45 = arith.truncf %44 : vector<2x8x8xf32> to vector<2x8x8xbf16>
    "tpu.trace_start"() <{level = 10 : i32, message = "bqk,bkd->bqd"}> : () -> ()
    %cst_15 = arith.constant dense<0.000000e+00> : vector<2x8x8xf32>
    %46 = tpu.matmul %45, %33, %cst_15 {dimension_numbers = #tpu.dot_dimension_numbers<[2], [1], [1], [2], [0, 0, 0, 1, 1, 2], [0], [0]>} : vector<2x8x8xbf16>, vector<2x8x8xbf16>, vector<2x8x8xf32> -> vector<2x8x8xf32>
    "tpu.trace_stop"() : () -> ()
    %47 = arith.truncf %46 : vector<2x8x8xf32> to vector<2x8x8xbf16>
    %48 = vector.extract_strided_slice %13 {offsets = [0, 0, 16], sizes = [2, 8, 8], strides = [1, 1, 1]} : vector<2x8x96xbf16> to vector<2x8x8xbf16>
    %49 = vector.extract_strided_slice %13 {offsets = [0, 0, 48], sizes = [2, 8, 8], strides = [1, 1, 1]} : vector<2x8x96xbf16> to vector<2x8x8xbf16>
    %50 = vector.extract_strided_slice %13 {offsets = [0, 0, 80], sizes = [2, 8, 8], strides = [1, 1, 1]} : vector<2x8x96xbf16> to vector<2x8x8xbf16>
    "tpu.trace_start"() <{level = 10 : i32, message = "bqd,bkd->bqk"}> : () -> ()
    %cst_16 = arith.constant dense<0.000000e+00> : vector<2x8x8xf32>
    %51 = tpu.matmul %48, %49, %cst_16 {dimension_numbers = #tpu.dot_dimension_numbers<[2], [2], [1], [1], [0, 0, 0, 1, 1, 1], [0], [0]>} : vector<2x8x8xbf16>, vector<2x8x8xbf16>, vector<2x8x8xf32> -> vector<2x8x8xf32>
    "tpu.trace_stop"() : () -> ()
    %cst_17 = arith.constant dense<0xFF800000> : vector<2x8xf32>
    %52 = vector.multi_reduction <maximumf>, %51, %cst_17 [2] : vector<2x8x8xf32> to vector<2x8xf32>
    %53 = vector.shape_cast %52 : vector<2x8xf32> to vector<2x8x1xf32>
    %54 = vector.broadcast %53 : vector<2x8x1xf32> to vector<2x8x8xf32>
    %55 = arith.subf %51, %54 : vector<2x8x8xf32>
    %56 = math.exp %55 : vector<2x8x8xf32>
    %cst_18 = arith.constant dense<0.000000e+00> : vector<2x8xf32>
    %57 = vector.multi_reduction <add>, %56, %cst_18 [2] : vector<2x8x8xf32> to vector<2x8xf32>
    %58 = vector.shape_cast %57 : vector<2x8xf32> to vector<2x8x1xf32>
    %59 = tpu.reciprocal %58 {approx = true} : vector<2x8x1xf32> -> vector<2x8x1xf32>
    %60 = vector.broadcast %59 : vector<2x8x1xf32> to vector<2x8x8xf32>
    %61 = arith.mulf %56, %60 : vector<2x8x8xf32>
    %62 = arith.truncf %61 : vector<2x8x8xf32> to vector<2x8x8xbf16>
    "tpu.trace_start"() <{level = 10 : i32, message = "bqk,bkd->bqd"}> : () -> ()
    %cst_19 = arith.constant dense<0.000000e+00> : vector<2x8x8xf32>
    %63 = tpu.matmul %62, %50, %cst_19 {dimension_numbers = #tpu.dot_dimension_numbers<[2], [1], [1], [2], [0, 0, 0, 1, 1, 2], [0], [0]>} : vector<2x8x8xbf16>, vector<2x8x8xbf16>, vector<2x8x8xf32> -> vector<2x8x8xf32>
    "tpu.trace_stop"() : () -> ()
    %64 = arith.truncf %63 : vector<2x8x8xf32> to vector<2x8x8xbf16>
    %65 = vector.extract_strided_slice %13 {offsets = [0, 0, 24], sizes = [2, 8, 8], strides = [1, 1, 1]} : vector<2x8x96xbf16> to vector<2x8x8xbf16>
    %66 = vector.extract_strided_slice %13 {offsets = [0, 0, 56], sizes = [2, 8, 8], strides = [1, 1, 1]} : vector<2x8x96xbf16> to vector<2x8x8xbf16>
    %67 = vector.extract_strided_slice %13 {offsets = [0, 0, 88], sizes = [2, 8, 8], strides = [1, 1, 1]} : vector<2x8x96xbf16> to vector<2x8x8xbf16>
    "tpu.trace_start"() <{level = 10 : i32, message = "bqd,bkd->bqk"}> : () -> ()
    %cst_20 = arith.constant dense<0.000000e+00> : vector<2x8x8xf32>
    %68 = tpu.matmul %65, %66, %cst_20 {dimension_numbers = #tpu.dot_dimension_numbers<[2], [2], [1], [1], [0, 0, 0, 1, 1, 1], [0], [0]>} : vector<2x8x8xbf16>, vector<2x8x8xbf16>, vector<2x8x8xf32> -> vector<2x8x8xf32>
    "tpu.trace_stop"() : () -> ()
    %cst_21 = arith.constant dense<0xFF800000> : vector<2x8xf32>
    %69 = vector.multi_reduction <maximumf>, %68, %cst_21 [2] : vector<2x8x8xf32> to vector<2x8xf32>
    %70 = vector.shape_cast %69 : vector<2x8xf32> to vector<2x8x1xf32>
    %71 = vector.broadcast %70 : vector<2x8x1xf32> to vector<2x8x8xf32>
    %72 = arith.subf %68, %71 : vector<2x8x8xf32>
    %73 = math.exp %72 : vector<2x8x8xf32>
    %cst_22 = arith.constant dense<0.000000e+00> : vector<2x8xf32>
    %74 = vector.multi_reduction <add>, %73, %cst_22 [2] : vector<2x8x8xf32> to vector<2x8xf32>
    %75 = vector.shape_cast %74 : vector<2x8xf32> to vector<2x8x1xf32>
    %76 = tpu.reciprocal %75 {approx = true} : vector<2x8x1xf32> -> vector<2x8x1xf32>
    %77 = vector.broadcast %76 : vector<2x8x1xf32> to vector<2x8x8xf32>
    %78 = arith.mulf %73, %77 : vector<2x8x8xf32>
    %79 = arith.truncf %78 : vector<2x8x8xf32> to vector<2x8x8xbf16>
    "tpu.trace_start"() <{level = 10 : i32, message = "bqk,bkd->bqd"}> : () -> ()
    %cst_23 = arith.constant dense<0.000000e+00> : vector<2x8x8xf32>
    %80 = tpu.matmul %79, %67, %cst_23 {dimension_numbers = #tpu.dot_dimension_numbers<[2], [1], [1], [2], [0, 0, 0, 1, 1, 2], [0], [0]>} : vector<2x8x8xbf16>, vector<2x8x8xbf16>, vector<2x8x8xf32> -> vector<2x8x8xf32>
    "tpu.trace_stop"() : () -> ()
    %81 = arith.truncf %80 : vector<2x8x8xf32> to vector<2x8x8xbf16>
    %82 = tpu.concatenate %30, %47, %64, %81 in 2 : vector<2x8x8xbf16>, vector<2x8x8xbf16>, vector<2x8x8xbf16>, vector<2x8x8xbf16> -> vector<2x8x32xbf16>
    %83 = vector.shape_cast %82 : vector<2x8x32xbf16> to vector<16x32xbf16>
    %c0_24 = arith.constant 0 : index
    %c0_25 = arith.constant 0 : index
    %c0_26 = arith.constant 0 : index
    %84 = vector.load %arg7[%c0_24, %c0_25, %c0_26] : memref<1x32x32xbf16, #tpu.memory_space<vmem>>, vector<1x32x32xbf16>
    %85 = vector.shape_cast %84 : vector<1x32x32xbf16> to vector<32x32xbf16>
    %cst_27 = arith.constant dense<0.000000e+00> : vector<16x32xf32>
    %86 = tpu.matmul %83, %85, %cst_27 {dimension_numbers = #tpu.dot_dimension_numbers<[1], [0], [0], [1], [0, 0, 1, 1], [], []>} : vector<16x32xbf16>, vector<32x32xbf16>, vector<16x32xf32> -> vector<16x32xf32>
    %c0_28 = arith.constant 0 : index
    %c0_29 = arith.constant 0 : index
    %c0_30 = arith.constant 0 : index
    %87 = vector.load %arg8[%c0_28, %c0_29, %c0_30] : memref<1x1x32xf32, #tpu.memory_space<vmem>>, vector<1x1x32xf32>
    %88 = vector.shape_cast %87 : vector<1x1x32xf32> to vector<1x32xf32>
    %89 = vector.broadcast %88 : vector<1x32xf32> to vector<16x32xf32>
    %90 = arith.addf %86, %89 : vector<16x32xf32>
    %91 = arith.addf %3, %90 : vector<16x32xf32>
    %c0_31 = arith.constant 0 : index
    %c0_32 = arith.constant 0 : index
    %c0_33 = arith.constant 0 : index
    %92 = vector.load %arg9[%c0_31, %c0_32, %c0_33] : memref<1x1x32xf32, #tpu.memory_space<vmem>>, vector<1x1x32xf32>
    %93 = vector.shape_cast %92 : vector<1x1x32xf32> to vector<1x32xf32>
    %c0_34 = arith.constant 0 : index
    %c0_35 = arith.constant 0 : index
    %c0_36 = arith.constant 0 : index
    %94 = vector.load %arg10[%c0_34, %c0_35, %c0_36] : memref<1x1x32xf32, #tpu.memory_space<vmem>>, vector<1x1x32xf32>
    %95 = vector.shape_cast %94 : vector<1x1x32xf32> to vector<1x32xf32>
    %cst_37 = arith.constant dense<0.000000e+00> : vector<16xf32>
    %96 = vector.multi_reduction <add>, %91, %cst_37 [1] : vector<16x32xf32> to vector<16xf32>
    %97 = vector.shape_cast %96 : vector<16xf32> to vector<16x1xf32>
    %cst_38 = arith.constant 3.200000e+01 : f32
    %98 = vector.broadcast %cst_38 : f32 to vector<16x1xf32>
    %99 = arith.divf %97, %98 : vector<16x1xf32>
    %100 = vector.broadcast %99 : vector<16x1xf32> to vector<16x32xf32>
    %101 = arith.subf %91, %100 : vector<16x32xf32>
    %102 = arith.mulf %101, %101 : vector<16x32xf32>
    %cst_39 = arith.constant dense<0.000000e+00> : vector<16xf32>
    %103 = vector.multi_reduction <add>, %102, %cst_39 [1] : vector<16x32xf32> to vector<16xf32>
    %104 = vector.shape_cast %103 : vector<16xf32> to vector<16x1xf32>
    %cst_40 = arith.constant 3.200000e+01 : f32
    %105 = vector.broadcast %cst_40 : f32 to vector<16x1xf32>
    %106 = arith.divf %104, %105 : vector<16x1xf32>
    %107 = vector.broadcast %99 : vector<16x1xf32> to vector<16x32xf32>
    %108 = arith.subf %91, %107 : vector<16x32xf32>
    %cst_41 = arith.constant 9.99999974E-6 : f32
    %109 = vector.broadcast %cst_41 : f32 to vector<16x1xf32>
    %110 = arith.addf %106, %109 : vector<16x1xf32>
    %111 = math.rsqrt %110 : vector<16x1xf32>
    %112 = vector.broadcast %111 : vector<16x1xf32> to vector<16x32xf32>
    %113 = arith.mulf %108, %112 : vector<16x32xf32>
    %114 = vector.broadcast %93 : vector<1x32xf32> to vector<16x32xf32>
    %115 = arith.mulf %113, %114 : vector<16x32xf32>
    %116 = vector.broadcast %95 : vector<1x32xf32> to vector<16x32xf32>
    %117 = arith.addf %115, %116 : vector<16x32xf32>
    %118 = arith.truncf %117 : vector<16x32xf32> to vector<16x32xbf16>
    %c0_42 = arith.constant 0 : index
    %c0_43 = arith.constant 0 : index
    %c0_44 = arith.constant 0 : index
    %119 = vector.load %arg13[%c0_42, %c0_43, %c0_44] : memref<1x32x128xbf16, #tpu.memory_space<vmem>>, vector<1x32x128xbf16>
    %120 = vector.shape_cast %119 : vector<1x32x128xbf16> to vector<32x128xbf16>
    %cst_45 = arith.constant dense<0.000000e+00> : vector<16x128xf32>
    %121 = tpu.matmul %118, %120, %cst_45 {dimension_numbers = #tpu.dot_dimension_numbers<[1], [0], [0], [1], [0, 0, 1, 1], [], []>} : vector<16x32xbf16>, vector<32x128xbf16>, vector<16x128xf32> -> vector<16x128xf32>
    %c0_46 = arith.constant 0 : index
    %c0_47 = arith.constant 0 : index
    %c0_48 = arith.constant 0 : index
    %122 = vector.load %arg14[%c0_46, %c0_47, %c0_48] : memref<1x1x128xf32, #tpu.memory_space<vmem>>, vector<1x1x128xf32>
    %123 = vector.shape_cast %122 : vector<1x1x128xf32> to vector<1x128xf32>
    %124 = vector.broadcast %123 : vector<1x128xf32> to vector<16x128xf32>
    %125 = arith.addf %121, %124 : vector<16x128xf32>
    %cst_49 = arith.constant 5.000000e-01 : f32
    %126 = vector.broadcast %cst_49 : f32 to vector<16x128xf32>
    %127 = arith.mulf %126, %125 : vector<16x128xf32>
    %cst_50 = arith.constant 0.707106769 : f32
    %128 = vector.broadcast %cst_50 : f32 to vector<16x128xf32>
    %129 = arith.mulf %125, %128 : vector<16x128xf32>
    %130 = math.absf %129 : vector<16x128xf32>
    %cst_51 = arith.constant 0.327591091 : f32
    %131 = vector.broadcast %cst_51 : f32 to vector<16x128xf32>
    %132 = arith.mulf %131, %130 : vector<16x128xf32>
    %cst_52 = arith.constant 1.000000e+00 : f32
    %133 = vector.broadcast %cst_52 : f32 to vector<16x128xf32>
    %134 = arith.addf %133, %132 : vector<16x128xf32>
    %135 = tpu.reciprocal %134 {approx = true} : vector<16x128xf32> -> vector<16x128xf32>
    %cst_53 = arith.constant 1.06140542 : f32
    %136 = vector.broadcast %cst_53 : f32 to vector<16x128xf32>
    %137 = arith.mulf %136, %135 : vector<16x128xf32>
    %cst_54 = arith.constant -1.45315206 : f32
    %138 = vector.broadcast %cst_54 : f32 to vector<16x128xf32>
    %139 = arith.addf %137, %138 : vector<16x128xf32>
    %140 = arith.mulf %139, %135 : vector<16x128xf32>
    %cst_55 = arith.constant 1.42141378 : f32
    %141 = vector.broadcast %cst_55 : f32 to vector<16x128xf32>
    %142 = arith.addf %140, %141 : vector<16x128xf32>
    %143 = arith.mulf %142, %135 : vector<16x128xf32>
    %cst_56 = arith.constant -0.284496725 : f32
    %144 = vector.broadcast %cst_56 : f32 to vector<16x128xf32>
    %145 = arith.addf %143, %144 : vector<16x128xf32>
    %146 = arith.mulf %145, %135 : vector<16x128xf32>
    %cst_57 = arith.constant 0.254829586 : f32
    %147 = vector.broadcast %cst_57 : f32 to vector<16x128xf32>
    %148 = arith.addf %146, %147 : vector<16x128xf32>
    %149 = arith.mulf %148, %135 : vector<16x128xf32>
    %cst_58 = arith.constant 0.000000e+00 : f32
    %150 = vector.broadcast %cst_58 : f32 to vector<16x128xf32>
    %151 = arith.subf %150, %130 : vector<16x128xf32>
    %152 = arith.mulf %151, %130 : vector<16x128xf32>
    %153 = math.exp %152 : vector<16x128xf32>
    %154 = arith.mulf %149, %153 : vector<16x128xf32>
    %cst_59 = arith.constant 1.000000e+00 : f32
    %155 = vector.broadcast %cst_59 : f32 to vector<16x128xf32>
    %156 = arith.subf %155, %154 : vector<16x128xf32>
    %cst_60 = arith.constant 0.000000e+00 : f32
    %157 = vector.broadcast %cst_60 : f32 to vector<16x128xf32>
    %158 = arith.cmpf oge, %129, %157 : vector<16x128xf32>
    %cst_61 = arith.constant 0.000000e+00 : f32
    %159 = vector.broadcast %cst_61 : f32 to vector<16x128xf32>
    %160 = arith.subf %159, %156 : vector<16x128xf32>
    %161 = arith.select %158, %156, %160 : vector<16x128xi1>, vector<16x128xf32>
    %cst_62 = arith.constant 1.000000e+00 : f32
    %162 = vector.broadcast %cst_62 : f32 to vector<16x128xf32>
    %163 = arith.addf %162, %161 : vector<16x128xf32>
    %164 = arith.mulf %127, %163 : vector<16x128xf32>
    %165 = arith.truncf %164 : vector<16x128xf32> to vector<16x128xbf16>
    %c0_63 = arith.constant 0 : index
    %c0_64 = arith.constant 0 : index
    %c0_65 = arith.constant 0 : index
    %166 = vector.load %arg15[%c0_63, %c0_64, %c0_65] : memref<1x128x32xbf16, #tpu.memory_space<vmem>>, vector<1x128x32xbf16>
    %167 = vector.shape_cast %166 : vector<1x128x32xbf16> to vector<128x32xbf16>
    %cst_66 = arith.constant dense<0.000000e+00> : vector<16x32xf32>
    %168 = tpu.matmul %165, %167, %cst_66 {dimension_numbers = #tpu.dot_dimension_numbers<[1], [0], [0], [1], [0, 0, 1, 1], [], []>} : vector<16x128xbf16>, vector<128x32xbf16>, vector<16x32xf32> -> vector<16x32xf32>
    %c0_67 = arith.constant 0 : index
    %c0_68 = arith.constant 0 : index
    %c0_69 = arith.constant 0 : index
    %169 = vector.load %arg16[%c0_67, %c0_68, %c0_69] : memref<1x1x32xf32, #tpu.memory_space<vmem>>, vector<1x1x32xf32>
    %170 = vector.shape_cast %169 : vector<1x1x32xf32> to vector<1x32xf32>
    %171 = vector.broadcast %170 : vector<1x32xf32> to vector<16x32xf32>
    %172 = arith.addf %168, %171 : vector<16x32xf32>
    %173 = arith.addf %117, %172 : vector<16x32xf32>
    %c0_70 = arith.constant 0 : index
    %c0_71 = arith.constant 0 : index
    %c0_72 = arith.constant 0 : index
    %174 = vector.load %arg11[%c0_70, %c0_71, %c0_72] : memref<1x1x32xf32, #tpu.memory_space<vmem>>, vector<1x1x32xf32>
    %175 = vector.shape_cast %174 : vector<1x1x32xf32> to vector<1x32xf32>
    %c0_73 = arith.constant 0 : index
    %c0_74 = arith.constant 0 : index
    %c0_75 = arith.constant 0 : index
    %176 = vector.load %arg12[%c0_73, %c0_74, %c0_75] : memref<1x1x32xf32, #tpu.memory_space<vmem>>, vector<1x1x32xf32>
    %177 = vector.shape_cast %176 : vector<1x1x32xf32> to vector<1x32xf32>
    %cst_76 = arith.constant dense<0.000000e+00> : vector<16xf32>
    %178 = vector.multi_reduction <add>, %173, %cst_76 [1] : vector<16x32xf32> to vector<16xf32>
    %179 = vector.shape_cast %178 : vector<16xf32> to vector<16x1xf32>
    %cst_77 = arith.constant 3.200000e+01 : f32
    %180 = vector.broadcast %cst_77 : f32 to vector<16x1xf32>
    %181 = arith.divf %179, %180 : vector<16x1xf32>
    %182 = vector.broadcast %181 : vector<16x1xf32> to vector<16x32xf32>
    %183 = arith.subf %173, %182 : vector<16x32xf32>
    %184 = arith.mulf %183, %183 : vector<16x32xf32>
    %cst_78 = arith.constant dense<0.000000e+00> : vector<16xf32>
    %185 = vector.multi_reduction <add>, %184, %cst_78 [1] : vector<16x32xf32> to vector<16xf32>
    %186 = vector.shape_cast %185 : vector<16xf32> to vector<16x1xf32>
    %cst_79 = arith.constant 3.200000e+01 : f32
    %187 = vector.broadcast %cst_79 : f32 to vector<16x1xf32>
    %188 = arith.divf %186, %187 : vector<16x1xf32>
    %189 = vector.broadcast %181 : vector<16x1xf32> to vector<16x32xf32>
    %190 = arith.subf %173, %189 : vector<16x32xf32>
    %cst_80 = arith.constant 9.99999974E-6 : f32
    %191 = vector.broadcast %cst_80 : f32 to vector<16x1xf32>
    %192 = arith.addf %188, %191 : vector<16x1xf32>
    %193 = math.rsqrt %192 : vector<16x1xf32>
    %194 = vector.broadcast %193 : vector<16x1xf32> to vector<16x32xf32>
    %195 = arith.mulf %190, %194 : vector<16x32xf32>
    %196 = vector.broadcast %175 : vector<1x32xf32> to vector<16x32xf32>
    %197 = arith.mulf %195, %196 : vector<16x32xf32>
    %198 = vector.broadcast %177 : vector<1x32xf32> to vector<16x32xf32>
    %199 = arith.addf %197, %198 : vector<16x32xf32>
    %c0_81 = arith.constant 0 : index
    %c0_82 = arith.constant 0 : index
    %200 = vector.load %arg20[%c0_81, %c0_82] : memref<16x32xf32, #tpu.memory_space<vmem>>, vector<16x32xf32>
    tpu.vector_store %arg20[%c0_81, %c0_82], %199 {strides = array<i32>} : memref<16x32xf32, #tpu.memory_space<vmem>>, vector<16x32xf32>,
    %c1_i32 = arith.constant 1 : i32
    %201 = arith.cmpi eq, %arg1, %c1_i32 : i32
    %202 = arith.extui %201 : i1 to i32
    %c0_i32_83 = arith.constant 0 : i32
    %203 = arith.cmpi ne, %202, %c0_i32_83 : i32
    scf.if %203 {
      %204 = vector.shape_cast %199 : vector<16x32xf32> to vector<2x8x32xf32>
      %cst_84 = arith.constant dense<0.000000e+00> : vector<2x32xf32>
      %205 = vector.multi_reduction <add>, %204, %cst_84 [1] : vector<2x8x32xf32> to vector<2x32xf32>
      %cst_85 = arith.constant 8.000000e+00 : f32
      %206 = vector.broadcast %cst_85 : f32 to vector<2x32xf32>
      %207 = arith.divf %205, %206 : vector<2x32xf32>
      %c0_86 = arith.constant 0 : index
      %c0_87 = arith.constant 0 : index
      %208 = vector.load %arg17[%c0_86, %c0_87] : memref<1x32xf32, #tpu.memory_space<vmem>>, vector<1x32xf32>
      %cst_88 = arith.constant dense<0.000000e+00> : vector<1x2xf32>
      %209 = tpu.matmul %208, %207, %cst_88 {dimension_numbers = #tpu.dot_dimension_numbers<[1], [1], [0], [0], [0, 0, 1, 0], [], []>} : vector<1x32xf32>, vector<2x32xf32>, vector<1x2xf32> -> vector<1x2xf32>
      %c0_89 = arith.constant 0 : index
      %c0_90 = arith.constant 0 : index
      %210 = vector.load %arg18[%c0_89, %c0_90] : memref<1x1xf32, #tpu.memory_space<vmem>>, vector<1x1xf32>
      %211 = vector.broadcast %210 : vector<1x1xf32> to vector<1x2xf32>
      %212 = arith.addf %209, %211 : vector<1x2xf32>
      %213 = arith.negf %212 : vector<1x2xf32>
      %214 = math.exp %213 : vector<1x2xf32>
      %cst_91 = arith.constant 1.000000e+00 : f32
      %215 = vector.broadcast %cst_91 : f32 to vector<1x2xf32>
      %216 = arith.addf %215, %214 : vector<1x2xf32>
      %217 = arith.divf %215, %216 : vector<1x2xf32>
      %c0_92 = arith.constant 0 : index
      %c0_93 = arith.constant 0 : index
      %c0_94 = arith.constant 0 : index
      %218 = vector.load %arg19[%c0_92, %c0_93, %c0_94] : memref<1x1x2xf32, #tpu.memory_space<vmem>>, vector<1x1x2xf32>
      %219 = vector.shape_cast %218 : vector<1x1x2xf32> to vector<1x2xf32>
      %220 = vector.shape_cast %217 : vector<1x2xf32> to vector<1x1x2xf32>
      tpu.vector_store %arg19[%c0_92, %c0_93, %c0_94], %220 {strides = array<i32>} : memref<1x1x2xf32, #tpu.memory_space<vmem>>, vector<1x1x2xf32>,
    } else {
    }
    return
  }
  func.func @transform_0(%arg0: i32, %arg1: i32) -> (i32, i32, i32) {
    %c0_i32 = arith.constant 0 : i32
    %c0_i32_0 = arith.constant 0 : i32
    %c0_i32_1 = arith.constant 0 : i32
    return %arg0, %c0_i32, %c0_i32_0 : i32, i32, i32
  }
  func.func @transform_1(%arg0: i32, %arg1: i32) -> (i32, i32) {
    %c0_i32 = arith.constant 0 : i32
    %c0_i32_0 = arith.constant 0 : i32
    %c0_i32_1 = arith.constant 0 : i32
    return %c0_i32, %c0_i32_0 : i32, i32
  }
  func.func @transform_2(%arg0: i32, %arg1: i32) -> (i32, i32) {
    %c0_i32 = arith.constant 0 : i32
    %c0_i32_0 = arith.constant 0 : i32
    %c0_i32_1 = arith.constant 0 : i32
    return %c0_i32, %c0_i32_0 : i32, i32
  }
  func.func @transform_3(%arg0: i32, %arg1: i32) -> (i32, i32, i32) {
    %c0_i32 = arith.constant 0 : i32
    %c0_i32_0 = arith.constant 0 : i32
    %c0_i32_1 = arith.constant 0 : i32
    return %arg1, %c0_i32, %c0_i32_0 : i32, i32, i32
  }
  func.func @transform_4(%arg0: i32, %arg1: i32) -> (i32, i32, i32) {
    %c0_i32 = arith.constant 0 : i32
    %c0_i32_0 = arith.constant 0 : i32
    %c0_i32_1 = arith.constant 0 : i32
    return %arg1, %c0_i32, %c0_i32_0 : i32, i32, i32
  }
  func.func @transform_5(%arg0: i32, %arg1: i32) -> (i32, i32, i32) {
    %c0_i32 = arith.constant 0 : i32
    %c0_i32_0 = arith.constant 0 : i32
    %c0_i32_1 = arith.constant 0 : i32
    return %arg1, %c0_i32, %c0_i32_0 : i32, i32, i32
  }
  func.func @transform_6(%arg0: i32, %arg1: i32) -> (i32, i32, i32) {
    %c0_i32 = arith.constant 0 : i32
    %c0_i32_0 = arith.constant 0 : i32
    %c0_i32_1 = arith.constant 0 : i32
    return %arg1, %c0_i32, %c0_i32_0 : i32, i32, i32
  }
  func.func @transform_7(%arg0: i32, %arg1: i32) -> (i32, i32, i32) {
    %c0_i32 = arith.constant 0 : i32
    %c0_i32_0 = arith.constant 0 : i32
    %c0_i32_1 = arith.constant 0 : i32
    return %arg1, %c0_i32, %c0_i32_0 : i32, i32, i32
  }
  func.func @transform_8(%arg0: i32, %arg1: i32) -> (i32, i32, i32) {
    %c0_i32 = arith.constant 0 : i32
    %c0_i32_0 = arith.constant 0 : i32
    %c0_i32_1 = arith.constant 0 : i32
    return %arg1, %c0_i32, %c0_i32_0 : i32, i32, i32
  }
  func.func @transform_9(%arg0: i32, %arg1: i32) -> (i32, i32, i32) {
    %c0_i32 = arith.constant 0 : i32
    %c0_i32_0 = arith.constant 0 : i32
    %c0_i32_1 = arith.constant 0 : i32
    return %arg1, %c0_i32, %c0_i32_0 : i32, i32, i32
  }
  func.func @transform_10(%arg0: i32, %arg1: i32) -> (i32, i32, i32) {
    %c0_i32 = arith.constant 0 : i32
    %c0_i32_0 = arith.constant 0 : i32
    %c0_i32_1 = arith.constant 0 : i32
    return %arg1, %c0_i32, %c0_i32_0 : i32, i32, i32
  }
  func.func @transform_11(%arg0: i32, %arg1: i32) -> (i32, i32, i32) {
    %c0_i32 = arith.constant 0 : i32
    %c0_i32_0 = arith.constant 0 : i32
    %c0_i32_1 = arith.constant 0 : i32
    return %arg1, %c0_i32, %c0_i32_0 : i32, i32, i32
  }
  func.func @transform_12(%arg0: i32, %arg1: i32) -> (i32, i32, i32) {
    %c0_i32 = arith.constant 0 : i32
    %c0_i32_0 = arith.constant 0 : i32
    %c0_i32_1 = arith.constant 0 : i32
    return %arg1, %c0_i32, %c0_i32_0 : i32, i32, i32
  }
  func.func @transform_13(%arg0: i32, %arg1: i32) -> (i32, i32, i32) {
    %c0_i32 = arith.constant 0 : i32
    %c0_i32_0 = arith.constant 0 : i32
    %c0_i32_1 = arith.constant 0 : i32
    return %arg1, %c0_i32, %c0_i32_0 : i32, i32, i32
  }
  func.func @transform_14(%arg0: i32, %arg1: i32) -> (i32, i32, i32) {
    %c0_i32 = arith.constant 0 : i32
    %c0_i32_0 = arith.constant 0 : i32
    %c0_i32_1 = arith.constant 0 : i32
    return %arg1, %c0_i32, %c0_i32_0 : i32, i32, i32
  }
  func.func @transform_15(%arg0: i32, %arg1: i32) -> (i32, i32) {
    %c0_i32 = arith.constant 0 : i32
    %c0_i32_0 = arith.constant 0 : i32
    %c0_i32_1 = arith.constant 0 : i32
    return %c0_i32, %c0_i32_0 : i32, i32
  }
  func.func @transform_16(%arg0: i32, %arg1: i32) -> (i32, i32) {
    %c0_i32 = arith.constant 0 : i32
    %c0_i32_0 = arith.constant 0 : i32
    %c0_i32_1 = arith.constant 0 : i32
    return %c0_i32, %c0_i32_0 : i32, i32
  }
  func.func @transform_17(%arg0: i32, %arg1: i32) -> (i32, i32, i32) {
    %c0_i32 = arith.constant 0 : i32
    %c0_i32_0 = arith.constant 0 : i32
    %c0_i32_1 = arith.constant 0 : i32
    return %arg0, %c0_i32, %c0_i32_0 : i32, i32, i32
  }
}

</mosaic_0001>

<bundles_post_ra>
// kernel: tpu_custom_call.1
= control target key start
LH: loop header
LB: loop body
LE: loop exit
PB: predicated region body
PF: predicated region fallthrough
CT: control target
= control target key end

     0   :  { %s3460_s0 = inlined_call_operand.vmem [shape: bf16[2,8,16], index: 0, kind: input, shape index: {}]   ;;  %s3461_s1 = inlined_call_operand.vmem [shape: bf16[16,32], index: 1, kind: input, shape index: {}]   ;;  %s3462_s2 = inlined_call_operand.vmem [shape: f32[1,32], index: 2, kind: input, shape index: {}]   ;;  %s3463_s3 = inlined_call_operand.vmem [shape: bf16[2,32,96], index: 3, kind: input, shape index: {}]   ;;  %s3464_s4 = inlined_call_operand.vmem [shape: f32[2,1,96], index: 4, kind: input, shape index: {}]   ;;  %s3465_s5 = inlined_call_operand.vmem [shape: bf16[2,32,32], index: 5, kind: input, shape index: {}]   ;;  %s3466_s6 = inlined_call_operand.vmem [shape: f32[2,1,32], index: 6, kind: input, shape index: {}]   ;;  %s3467_s7 = inlined_call_operand.vmem [shape: f32[2,1,32], index: 7, kind: input, shape index: {}]   ;;  %s3468_s8 = inlined_call_operand.vmem [shape: f32[2,1,32], index: 8, kind: input, shape index: {}]   ;;  %s3469_s9 = inlined_call_operand.vmem [shape: f32[2,1,32], index: 9, kind: input, shape index: {}]   ;;  %s3470_s10 = inlined_call_operand.vmem [shape: f32[2,1,32], index: 10, kind: input, shape index: {}]   ;;  %s3471_s11 = inlined_call_operand.vmem [shape: bf16[2,32,128], index: 11, kind: input, shape index: {}]   ;;  %s3472_s12 = inlined_call_operand.vmem [shape: f32[2,1,128], index: 12, kind: input, shape index: {}]   ;;  %s3473_s13 = inlined_call_operand.vmem [shape: bf16[2,128,32], index: 13, kind: input, shape index: {}]   ;;  %s3474_s14 = inlined_call_operand.vmem [shape: f32[2,1,32], index: 14, kind: input, shape index: {}]   ;;  %s3475_s15 = inlined_call_operand.vmem [shape: f32[1,32], index: 15, kind: input, shape index: {}]   ;;  %s3476_s16 = inlined_call_operand.<no memory space> [shape: f32[1,1], index: 16, kind: input, shape index: {}]   ;;  %s3477_s17 = inlined_call_operand.hbm [shape: f32[1,1,2], index: 17, kind: output, shape index: {}]  }
   0x1   :  { %3481 = sst [smem:[#allocation11_spill]] %s3460_s0  ;;  %v22_v0 = vstv %s3476_s16 }
   0x2   :  { %3482 = sst [smem:[#allocation12_spill]] %s3461_s1  ;;  %23 = vst [vmem:[#allocation3] sm:$0x1] %v22_v0 }
   0x3   :  { %3483 = sst [smem:[#allocation13_spill]] %s3463_s3 }
   0x4   :  { %3484 = sst [smem:[#allocation14_spill]] %s3464_s4 }
   0x5   :  { %3485 = sst [smem:[#allocation15_spill]] %s3465_s5 }
   0x6   :  { %3486 = sst [smem:[#allocation16_spill]] %s3475_s15 }
   0x7   :  { %3487 = sst [smem:[#allocation17_spill]] %s3477_s17 }
   0x8   :  { %24 = vsyncpa [#allocation5], 0  ;;  %s3090_s26 = smov 0   ;;  %s3092_s27 = smov 0  }
   0x9   :  { %s3094_s28 = smov 0  }
   0xa LB: > { %3488 = sst [smem:[#allocation7_spill]] %s2969_s27  ;;  %s39_s29 = sadd.s32 1, %s2969_s27  ;;  %s2973_s28 = sphi %s3094_s28, %s30_s28   ;;  %s2969_s27 = sphi %s3092_s27, %s3509_s27   ;;  %s2965_s26 = sphi %s3090_s26, %s3508_s26  }
   0xb   : > { %3489 = sst [smem:[#allocation8_spill]] %s2973_s28  ;;  %p40_p0 = scmp.ge.s32.totalorder %s39_s29, 2 }
   0xc   : > { %p2525_p1 = scmp.ge.s32.totalorder %s2973_s28, 1  ;;  %p607_p2 = scmp.lt.s32.totalorder %s2973_s28, 3 }
   0xd   : > { %s3511_s29 = smov (%p40_p0, %s39_s29), 0 }
   0xe   : > { %3490 = sst [smem:[#allocation9_spill]] %s3511_s29  ;;  %p608_p3 = pnand %p2525_p1, %p607_p2 }
  0x10   : > { %611 = sbr.rel (%p608_p3) target bundleno = 4488 (0x1188), region = 88 }
  0x15   : > { %p704_p4 = scmp.lt.s32.totalorder %s2965_s26, 1  ;;  %s3492_s3 = sld [smem:[#allocation13_spill]] }
  0x16   : > { %s3493_s5 = sld [smem:[#allocation15_spill]]  ;;  %p2534_p5 = scmp.ne.s32.totalorder %s2965_s26, 0 }
  0x17   : > { %s3113_s0 = scalar_select %p704_p4, %s2965_s26, 1 }
  0x18   : > { %s3496_s17 = sld [smem:[#allocation11_spill]] (!%p2534_p5) }
  0x19   : > { %s2591_s30 = sshll.u32 %s3113_s0, 4  ;;  %s719_s27 = scalar_lea.vmem %s3466_s6, %s3113_s0 }
  0x1a   : > { %s731_s24 = scalar_lea.vmem %s3470_s10, %s3113_s0  ;;  %s3153_s16 = scalar_lea.vmem %s3471_s11, %s2591_s30 }
  0x1b   : > { %s3123_s22 = scalar_lea.vmem %s3492_s3, %s2591_s30  ;;  %s728_s3 = scalar_lea.vmem %s3469_s9, %s3113_s0 }
  0x1c   : > { %s3128_s25 = scalar_lea.vmem %s3493_s5, %s2591_s30  ;;  %s739_s28 = scalar_lea.vmem %s3472_s12, %s3113_s0 }
  0x1d   : > { %3494 = sst [smem:[#allocation10_spill]] %s3128_s25  ;;  %s2594_s15 = sshll.u32 %s3113_s0, 6 }
  0x1e   : > { %s3163_s1 = scalar_lea.vmem %s3473_s13, %s2594_s15  ;;  %s747_s4 = scalar_lea.vmem %s3474_s14, %s3113_s0 }
  0x1f   : > { %752 = sbr.rel (%p2534_p5) target bundleno = 241 (0xf1), region = 92  ;;  %s3495_s25 = sld [smem:[#allocation12_spill]] (!%p2534_p5) }
  0x24   : > { %v2975_v2 = vmov 0.0   ;;  %v2855_v3 = vld [vmem:[%s3496_s17] sm:$0xff]   ;;  %vm2976_vm0 = vmmov 0   ;;  %vm775_vm1 = vcmask 130048   ;;  %vm820_vm2 = vcmask 261120  }
  0x25   : > { %v2854_v1 = vld [vmem:[%s3495_s25] sm:$0xff]   ;;  %2651 = vmatprep.subr.bf16.mxu0 %v2975_v2  ;;  %2653 = vmatprep.mubr.msk.bf16.mxu0 %vm2976_vm0, %v2975_v2 }
  0x26   : > { %2652 = vmatpush3.bf16.msra.mxu0 %v2854_v1  ;;  %v2535_v4 = vld [vmem:[%s3462_s2] ss:$0 sm:$0xff] }
  0x29   : > { %2654 = vmatmul.mubr.msk.bf16.vlgmr.msra.gmra.mxu0 %vm775_vm1, %v2855_v3 }
  0xe9   : > { %v813_v5 = vpop.f32.mrf.mxu0 }
  0xea   : > { %v814_v6 = vadd.f32 %v2535_v4, %v813_v5 }
  0xeb   : > { %v2655_v7 = vpop.f32.mrf.mxu0 }
  0xec   : > { %821 = vst.msk [vmem:[#allocation2] sm:$0xff] %vm820_vm2, %v814_v6 }
  0xed   : > { %v816_v8 = vpop.f32.mrf.mxu0 }
  0xee   : > { %v817_v9 = vadd.f32 %v2535_v4, %v816_v8 }
  0xef   : > { %v2656_v10 = vpop.f32.mrf.mxu0 }
  0xf0   : > { %822 = vst.msk [vmem:[#allocation2 + $0x8] sm:$0xff] %vm820_vm2, %v817_v9 }
  0xf1 PF: > { %v2856_v11 = vld [vmem:[%s3123_s22 + $0x8] sm:$0xff]   ;;  %v2977_v12 = vmov 0.0   ;;  %v2857_v13 = vld [vmem:[%s3123_s22] sm:$0xff]   ;;  %vm2978_vm3 = vmmov 0   ;;  %vm849_vm4 = vcmask 261120   ;;  %s3497_s20 = sld [smem:[#allocation14_spill]] }
  0xf2   : > { %2657 = vmatprep.subr.bf16.mxu0 %v2977_v12  ;;  %2677 = vmatprep.subr.bf16.mxu1 %v2977_v12  ;;  %s2979_s5 = smov 96   ;;  %vm902_vm5 = vcmask 64512   ;;  %s2980_s30 = smov 64   ;;  %vm1026_vm6 = vcmask 1043456   ;;  %vm1810_vm7 = vcmask 130048   ;;  %vm1815_vm8 = vcmask 195584  }
  0xf3   : > { %2658 = vmatpush3.bf16.msra.mxu0 %v2856_v11  ;;  %2661 = vmatprep.mubr.msk.bf16.mxu0 %vm2978_vm3, %v2977_v12  ;;  %v3185_v14 = vld [vmem:[#allocation2] sm:$0xff]  ;;  %s2981_s25 = smov 88   ;;  %s2982_s23 = smov 120  }
  0xf4   : > { %2659 = vmatprep.subr.bf16.mxu0 %v2977_v12  ;;  %2679 = vmatprep.mubr.msk.bf16.mxu1 %vm2978_vm3, %v2977_v12  ;;  %s2983_s29 = smov 56   ;;  %s2984_s17 = smov 80  }
  0xf5   : > { %s2985_s15 = smov 112   ;;  %s2986_s18 = smov 48  }
  0xf6   : > { %s2987_s22 = smov 72   ;;  %s2988_s19 = smov 104  }
  0xf7   : > { %v3187_v15 = vld [vmem:[#allocation2 + $0x8] sm:$0xff]  ;;  %2660 = vmatpush3.bf16.msra.mxu0 %v2857_v13  ;;  %s3498_s21 = scalar_lea.vmem %s3497_s20, %s3113_s0  ;;  %s2989_s20 = smov 40  }
  0xf8   : > { %v825_v16 = vpack.c.bf16 %v3187_v15, %v3185_v14  ;;  %2665 = vmatprep.subr.bf16.mxu0 %v2977_v12  ;;  %v2539_v17 = vld [vmem:[%s3498_s21] ss:$0 sm:$0xff]  ;;  %s2990_s21 = smov 8   ;;  %p2583_p6 = scmp.ne.s32.totalorder %s2965_s26, 1 }
  0xfa   : > { %2662 = vmatmul.mubr.msk.bf16.vlgmr.msra.gmra.mxu0 %vm849_vm4, %v825_v16 }
  0xfb   : > { %2667 = vmatprep.mubr.msk.bf16.mxu0 %vm2978_vm3, %v2977_v12 }
 0x1ba   : > { %v887_v18 = vpop.f32.mrf.mxu0 }
 0x1bb   : > { %v888_v19 = vadd.f32 %v2539_v17, %v887_v18 }
 0x1bc   : > { %v2663_v20 = vpop.f32.mrf.mxu0 }
 0x1bd   : > { %v3203_v21 = vpack.c.bf16 %v888_v19, %v888_v19 }
 0x1be   : > { %v890_v22 = vpop.f32.mrf.mxu0 }
 0x1bf   : > { %v891_v23 = vadd.f32 %v2539_v17, %v890_v22  ;;  %900 = vrot.lane.b32.xlu0 %v3203_v21, %s2979_s5 }
 0x1c0   : > { %v2664_v24 = vpop.f32.mrf.mxu0 }
 0x1c1   : > { %v3206_v25 = vpack.c.bf16 %v891_v23, %v891_v23 }
 0x1c3   : > { %949 = vrot.lane.b32.xlu0 %v3206_v25, %s2979_s5  ;;  %s2991_s5 = smov 16  }
 0x231   : > { %v901_v26 = vpop.permute.xlu0 %900 }
 0x232   : > { %v907_v27 = vsel %vm902_vm5, %v901_v26, 0 }
 0x233   : > { %2666 = vmatpush3.bf16.xpose.msra.mxu0 %v907_v27 }
 0x234   : > { %2671 = vmatprep.subr.bf16.mxu0 %v2977_v12 }
 0x235   : > { %v950_v28 = vpop.permute.xlu0 %949 }
 0x236   : > { %v955_v29 = vsel %vm902_vm5, %v950_v28, 0 }
 0x23a   : > { %2668 = vmatmul.mubr.msk.bf16.vlgmr.msra.gmra.mxu0 %vm902_vm5, %v3203_v21 }
 0x23b   : > { %2672 = vmatpush3.bf16.xpose.msra.mxu0 %v955_v29  ;;  %2673 = vmatprep.mubr.msk.bf16.mxu0 %vm2978_vm3, %v2977_v12 }
 0x23c   : > { %2683 = vmatprep.subr.bf16.mxu0 %v2977_v12 }
 0x242   : > { %2674 = vmatmul.mubr.msk.bf16.vlgmr.msra.gmra.mxu0 %vm902_vm5, %v3206_v25 }
 0x243   : > { %2685 = vmatprep.mubr.msk.bf16.mxu0 %vm2978_vm3, %v2977_v12 }
 0x2fa   : > { %v943_v30 = vpop.f32.mrf.mxu0 }
 0x2fb   : > { %v997_v31 = vsel %vm902_vm5, %v943_v30, -inf }
 0x2fc   : > { %998 = vmax.xlane.f32.xlu1 %v997_v31  ;;  %v2669_v32 = vpop.f32.mrf.mxu0 }
 0x2fe   : > { %v946_v33 = vpop.f32.mrf.mxu0 }
 0x300   : > { %v2670_v34 = vpop.f32.mrf.mxu0 }
 0x302   : > { %v991_v35 = vpop.f32.mrf.mxu0 }
 0x303   : > { %v1000_v36 = vsel %vm902_vm5, %v991_v35, -inf }
 0x304   : > { %1001 = vmax.xlane.f32.xlu1 %v1000_v36  ;;  %v2675_v37 = vpop.f32.mrf.mxu0 }
 0x306   : > { %v994_v38 = vpop.f32.mrf.mxu0 }
 0x308   : > { %v2676_v39 = vpop.f32.mrf.mxu0 }
 0x315   : > { %1021 = vrot.lane.b32.xlu1 %v3203_v21, %s2980_s30 }
 0x319   : > { %1070 = vrot.lane.b32.xlu1 %v3206_v25, %s2980_s30  ;;  %s3499_s30 = sld [smem:[#allocation10_spill]] }
 0x31d   : > { %1122 = vrot.lane.b32.xlu1 %v3203_v21, %s2981_s25 }
 0x385   : > { %v999_v40 = vpop.xlane.xlu1 %998 }
 0x386   : > { %v1003_v41 = vsub.f32 %v943_v30, %v999_v40 }
 0x388   : > { %v1005_v42 = vmul.f32 1.442695, %v1003_v41 }
 0x38a   : > { %2870 = vpow2.f32 %v1005_v42 }
 0x38d   : > { %v1002_v43 = vpop.xlane.xlu1 %1001 }
 0x38e   : > { %v1004_v44 = vsub.f32 %v991_v35, %v1002_v43 }
 0x390   : > { %v1007_v45 = vmul.f32 1.442695, %v1004_v44 }
 0x391   : > { %v1022_v46 = vpop.permute.xlu1 %1021 }
 0x392   : > { %2872 = vpow2.f32 %v1007_v45  ;;  %v1028_v47 = vsel %vm1026_vm6, %v1022_v46, 0 }
 0x393   : > { %2678 = vmatpush3.bf16.msra.mxu1 %v1028_v47 }
 0x394   : > { %2689 = vmatprep.subr.bf16.mxu1 %v2977_v12 }
 0x395   : > { %v1071_v48 = vpop.permute.xlu1 %1070 }
 0x396   : > { %v1076_v49 = vsel %vm1026_vm6, %v1071_v48, 0 }
 0x397   : > { %v2871_v50 = vpop.eup %2870  ;;  %2684 = vmatpush3.bf16.msra.mxu0 %v1076_v49 }
 0x398   : > { %v1009_v51 = vsel %vm902_vm5, %v2871_v50, 0.0  ;;  %2695 = vmatprep.subr.bf16.mxu0 %v2977_v12 }
 0x399   : > { %1010 = vadd.xlane.f32.xlu0 %v1009_v51  ;;  %v1123_v55 = vpop.permute.xlu1 %1122 }
 0x39a   : > { %v1128_v60 = vsel %vm902_vm5, %v1123_v55, 0 }
 0x39f   : > { %v2873_v52 = vpop.eup %2872 }
 0x3a0   : > { %v1012_v53 = vsel %vm902_vm5, %v2873_v52, 0.0 }
 0x3a1   : > { %1013 = vadd.xlane.f32.xlu1 %v1012_v53 }
 0x3af   : > { %1120 = vrot.lane.b32.xlu0 %v3203_v21, %s2982_s23 }
 0x3b2   : > { %1172 = vrot.lane.b32.xlu1 %v3206_v25, %s2981_s25  ;;  %s2992_s25 = smov 24  }
 0x3b6   : > { %1170 = vrot.lane.b32.xlu1 %v3206_v25, %s2982_s23 }
 0x422   : > { %v1011_v54 = vpop.xlane.xlu0 %1010 }
 0x423   : > { %2874 = vrcp.f32 %v1011_v54 }
 0x426   : > { %v1121_v1 = vpop.permute.xlu0 %1120 }
 0x42a   : > { %v1014_v56 = vpop.xlane.xlu1 %1013 }
 0x42b   : > { %2876 = vrcp.f32 %v1014_v56 }
 0x42e   : > { %v1173_v63 = vpop.permute.xlu1 %1172 }
 0x42f   : > { %v1178_v2 = vsel %vm902_vm5, %v1173_v63, 0 }
 0x430   : > { %v2875_v57 = vpop.eup %2874 }
 0x431   : > { %v1017_v58 = vmul.f32 %v2875_v57, %v2871_v50 }
 0x432   : > { %v1171_v3 = vpop.permute.xlu1 %1170 }
 0x433   : > { %v1019_v59 = vpack.c.bf16 %v1017_v58, %v1017_v58 }
 0x435   : > { %2680 = vmatmul.mubr.msk.bf16.vlgmr.msra.gmra.mxu1 %vm902_vm5, %v1019_v59 }
 0x436   : > { %2690 = vmatpush3.bf16.xpose.msra.mxu1 %v1128_v60  ;;  %2691 = vmatprep.mubr.msk.bf16.mxu1 %vm2978_vm3, %v2977_v12 }
 0x437   : > { %2701 = vmatprep.subr.bf16.mxu1 %v2977_v12 }
 0x438   : > { %v2877_v61 = vpop.eup %2876 }
 0x439   : > { %v1018_v62 = vmul.f32 %v2877_v61, %v2873_v52 }
 0x43b   : > { %v1020_v0 = vpack.c.bf16 %v1018_v62, %v1018_v62 }
 0x43d   : > { %2686 = vmatmul.mubr.msk.bf16.vlgmr.msra.gmra.mxu0 %vm902_vm5, %v1020_v0  ;;  %2692 = vmatmul.mubr.msk.bf16.vlgmr.msra.gmra.mxu1 %vm902_vm5, %v1121_v1 }
 0x43e   : > { %2696 = vmatpush3.bf16.xpose.msra.mxu0 %v1178_v2  ;;  %2697 = vmatprep.mubr.msk.bf16.mxu0 %vm2978_vm3, %v2977_v12 }
 0x43f   : > { %2707 = vmatprep.subr.bf16.mxu0 %v2977_v12  ;;  %2703 = vmatprep.mubr.msk.bf16.mxu1 %vm2978_vm3, %v2977_v12 }
 0x445   : > { %2698 = vmatmul.mubr.msk.bf16.vlgmr.msra.gmra.mxu0 %vm902_vm5, %v1171_v3 }
 0x446   : > { %2709 = vmatprep.mubr.msk.bf16.mxu0 %vm2978_vm3, %v2977_v12 }
 0x4f5   : > { %v3251_v4 = vpop.f32.mrf.mxu1 }
 0x4f7   : > { %v2681_v5 = vpop.f32.mrf.mxu1 }
 0x4f9   : > { %v1067_v6 = vpop.f32.mrf.mxu1 }
 0x4fb   : > { %v2682_v7 = vpop.f32.mrf.mxu1 }
 0x4fd   : > { %v3253_v8 = vpop.f32.mrf.mxu0  ;;  %v1164_v9 = vpop.f32.mrf.mxu1 }
 0x4fe   : > { %v1220_v10 = vsel %vm902_vm5, %v1164_v9, -inf }
 0x4ff   : > { %1221 = vmax.xlane.f32.xlu1 %v1220_v10  ;;  %v2687_v11 = vpop.f32.mrf.mxu0  ;;  %v2693_v13 = vpop.f32.mrf.mxu1 }
 0x501   : > { %v1115_v16 = vpop.f32.mrf.mxu0  ;;  %v1167_v17 = vpop.f32.mrf.mxu1 }
 0x503   : > { %v2688_v18 = vpop.f32.mrf.mxu0  ;;  %v2694_v19 = vpop.f32.mrf.mxu1 }
 0x505   : > { %v1214_v20 = vpop.f32.mrf.mxu0 }
 0x506   : > { %v1223_v22 = vsel %vm902_vm5, %v1214_v20, -inf }
 0x507   : > { %1224 = vmax.xlane.f32.xlu0 %v1223_v22  ;;  %v2699_v23 = vpop.f32.mrf.mxu0 }
 0x509   : > { %v1217_v24 = vpop.f32.mrf.mxu0 }
 0x50b   : > { %v2700_v26 = vpop.f32.mrf.mxu0 }
 0x510   : > { %1244 = vrot.lane.b32.xlu1 %v3203_v21, %s2983_s29 }
 0x514   : > { %1344 = vrot.lane.b32.xlu1 %v3203_v21, %s2984_s17 }
 0x51d   : > { %1292 = vrot.lane.b32.xlu0 %v3206_v25, %s2983_s29 }
 0x521   : > { %1342 = vrot.lane.b32.xlu0 %v3203_v21, %s2985_s15 }
 0x588   : > { %v1222_v27 = vpop.xlane.xlu1 %1221 }
 0x589   : > { %v1226_v28 = vsub.f32 %v1164_v9, %v1222_v27 }
 0x58b   : > { %v1228_v29 = vmul.f32 1.442695, %v1226_v28 }
 0x58c   : > { %v1245_v30 = vpop.permute.xlu1 %1244 }
 0x58d   : > { %2878 = vpow2.f32 %v1228_v29  ;;  %v1250_v31 = vsel %vm1026_vm6, %v1245_v30, 0 }
 0x58e   : > { %2702 = vmatpush3.bf16.msra.mxu1 %v1250_v31 }
 0x58f   : > { %2713 = vmatprep.subr.bf16.mxu1 %v2977_v12 }
 0x590   : > { %v1225_v32 = vpop.xlane.xlu0 %1224  ;;  %v1345_v41 = vpop.permute.xlu1 %1344 }
 0x591   : > { %v1227_v33 = vsub.f32 %v1214_v20, %v1225_v32  ;;  %v1350_v47 = vsel %vm902_vm5, %v1345_v41, 0 }
 0x593   : > { %v1230_v34 = vmul.f32 1.442695, %v1227_v33 }
 0x594   : > { %v1293_v35 = vpop.permute.xlu0 %1292 }
 0x595   : > { %2880 = vpow2.f32 %v1230_v34  ;;  %v1298_v36 = vsel %vm1026_vm6, %v1293_v35, 0 }
 0x596   : > { %2708 = vmatpush3.bf16.msra.mxu0 %v1298_v36 }
 0x597   : > { %2719 = vmatprep.subr.bf16.mxu0 %v2977_v12 }
 0x598   : > { %v1343_v52 = vpop.permute.xlu0 %1342 }
 0x59a   : > { %v2879_v37 = vpop.eup %2878 }
 0x59b   : > { %v1232_v38 = vsel %vm902_vm5, %v2879_v37, 0.0 }
 0x59c   : > { %1233 = vadd.xlane.f32.xlu1 %v1232_v38 }
 0x5a2   : > { %v2881_v39 = vpop.eup %2880 }
 0x5a3   : > { %v1235_v40 = vsel %vm902_vm5, %v2881_v39, 0.0 }
 0x5a4   : > { %1236 = vadd.xlane.f32.xlu1 %v1235_v40 }
 0x5b5   : > { %1394 = vrot.lane.b32.xlu1 %v3206_v25, %s2984_s17 }
 0x5b9   : > { %1392 = vrot.lane.b32.xlu1 %v3206_v25, %s2985_s15 }
 0x625   : > { %v1234_v42 = vpop.xlane.xlu1 %1233 }
 0x626   : > { %2882 = vrcp.f32 %v1234_v42 }
 0x62d   : > { %v1237_v43 = vpop.xlane.xlu1 %1236 }
 0x62e   : > { %2884 = vrcp.f32 %v1237_v43 }
 0x631   : > { %v1395_v50 = vpop.permute.xlu1 %1394 }
 0x632   : > { %v1400_v53 = vsel %vm902_vm5, %v1395_v50, 0 }
 0x633   : > { %v2883_v44 = vpop.eup %2882 }
 0x634   : > { %v1240_v45 = vmul.f32 %v2883_v44, %v2879_v37 }
 0x635   : > { %v1393_v54 = vpop.permute.xlu1 %1392 }
 0x636   : > { %v1242_v46 = vpack.c.bf16 %v1240_v45, %v1240_v45 }
 0x638   : > { %2704 = vmatmul.mubr.msk.bf16.vlgmr.msra.gmra.mxu1 %vm902_vm5, %v1242_v46 }
 0x639   : > { %2714 = vmatpush3.bf16.xpose.msra.mxu1 %v1350_v47  ;;  %2715 = vmatprep.mubr.msk.bf16.mxu1 %vm2978_vm3, %v2977_v12 }
 0x63a   : > { %2725 = vmatprep.subr.bf16.mxu1 %v2977_v12 }
 0x63b   : > { %v2885_v48 = vpop.eup %2884 }
 0x63c   : > { %v1241_v49 = vmul.f32 %v2885_v48, %v2881_v39 }
 0x63e   : > { %v1243_v51 = vpack.c.bf16 %v1241_v49, %v1241_v49 }
 0x640   : > { %2710 = vmatmul.mubr.msk.bf16.vlgmr.msra.gmra.mxu0 %vm902_vm5, %v1243_v51  ;;  %2716 = vmatmul.mubr.msk.bf16.vlgmr.msra.gmra.mxu1 %vm902_vm5, %v1343_v52 }
 0x641   : > { %2720 = vmatpush3.bf16.xpose.msra.mxu0 %v1400_v53  ;;  %2721 = vmatprep.mubr.msk.bf16.mxu0 %vm2978_vm3, %v2977_v12 }
 0x642   : > { %2731 = vmatprep.subr.bf16.mxu0 %v2977_v12  ;;  %2727 = vmatprep.mubr.msk.bf16.mxu1 %vm2978_vm3, %v2977_v12 }
 0x648   : > { %2722 = vmatmul.mubr.msk.bf16.vlgmr.msra.gmra.mxu0 %vm902_vm5, %v1393_v54 }
 0x649   : > { %2733 = vmatprep.mubr.msk.bf16.mxu0 %vm2978_vm3, %v2977_v12 }
 0x6f8   : > { %v3285_v55 = vpop.f32.mrf.mxu1 }
 0x6fa   : > { %v2705_v56 = vpop.f32.mrf.mxu1 }
 0x6fc   : > { %v1289_v57 = vpop.f32.mrf.mxu1 }
 0x6fe   : > { %v2706_v58 = vpop.f32.mrf.mxu1 }
 0x700   : > { %v3287_v59 = vpop.f32.mrf.mxu0  ;;  %v1386_v60 = vpop.f32.mrf.mxu1 }
 0x701   : > { %v1442_v61 = vsel %vm902_vm5, %v1386_v60, -inf }
 0x702   : > { %1443 = vmax.xlane.f32.xlu0 %v1442_v61  ;;  %v2711_v62 = vpop.f32.mrf.mxu0  ;;  %v2717_v63 = vpop.f32.mrf.mxu1 }
 0x704   : > { %v1337_v0 = vpop.f32.mrf.mxu0  ;;  %v1389_v1 = vpop.f32.mrf.mxu1 }
 0x705   : > { %v1340_v0 = vpack.c.bf16 %v3285_v55, %v3285_v55  ;;  %v1341_v1 = vpack.c.bf16 %v3287_v59, %v3287_v59 }
 0x706   : > { %v2712_v2 = vpop.f32.mrf.mxu0  ;;  %v2718_v3 = vpop.f32.mrf.mxu1 }
 0x708   : > { %v1436_v5 = vpop.f32.mrf.mxu0 }
 0x709   : > { %v1445_v6 = vsel %vm902_vm5, %v1436_v5, -inf }
 0x70a   : > { %1446 = vmax.xlane.f32.xlu1 %v1445_v6  ;;  %v2723_v7 = vpop.f32.mrf.mxu0 }
 0x70c   : > { %v1439_v9 = vpop.f32.mrf.mxu0 }
 0x70e   : > { %v2724_v10 = vpop.f32.mrf.mxu0 }
 0x71b   : > { %1466 = vrot.lane.b32.xlu1 %v3203_v21, %s2986_s18 }
 0x71f   : > { %1566 = vrot.lane.b32.xlu1 %v3203_v21, %s2987_s22 }
 0x723   : > { %1616 = vrot.lane.b32.xlu1 %v3206_v25, %s2987_s22  ;;  %s3501_s22 = scalar_lea.vmem %s3468_s8, %s3113_s0 }
 0x727   : > { %1614 = vrot.lane.b32.xlu1 %v3206_v25, %s2988_s19 }
 0x78b   : > { %v1444_v11 = vpop.xlane.xlu0 %1443 }
 0x78c   : > { %v1448_v13 = vsub.f32 %v1386_v60, %v1444_v11 }
 0x78e   : > { %v1450_v16 = vmul.f32 1.442695, %v1448_v13 }
 0x790   : > { %2886 = vpow2.f32 %v1450_v16 }
 0x793   : > { %v1447_v17 = vpop.xlane.xlu1 %1446 }
 0x794   : > { %v1449_v18 = vsub.f32 %v1436_v5, %v1447_v17 }
 0x796   : > { %v1452_v19 = vmul.f32 1.442695, %v1449_v18 }
 0x797   : > { %v1467_v20 = vpop.permute.xlu1 %1466 }
 0x798   : > { %2888 = vpow2.f32 %v1452_v19  ;;  %v1472_v22 = vsel %vm1026_vm6, %v1467_v20, 0 }
 0x799   : > { %2726 = vmatpush3.bf16.msra.mxu1 %v1472_v22 }
 0x79a   : > { %2737 = vmatprep.subr.bf16.mxu1 %v2977_v12 }
 0x79b   : > { %v1567_v34 = vpop.permute.xlu1 %1566 }
 0x79c   : > { %v1572_v36 = vsel %vm902_vm5, %v1567_v34, 0 }
 0x79d   : > { %v2887_v23 = vpop.eup %2886 }
 0x79e   : > { %v1454_v24 = vsel %vm902_vm5, %v2887_v23, 0.0 }
 0x79f   : > { %1455 = vadd.xlane.f32.xlu0 %v1454_v24  ;;  %v1617_v39 = vpop.permute.xlu1 %1616 }
 0x7a0   : > { %v1622_v42 = vsel %vm902_vm5, %v1617_v39, 0 }
 0x7a3   : > { %v1615_v43 = vpop.permute.xlu1 %1614 }
 0x7a5   : > { %v2889_v26 = vpop.eup %2888 }
 0x7a6   : > { %v1457_v27 = vsel %vm902_vm5, %v2889_v26, 0.0 }
 0x7a7   : > { %1458 = vadd.xlane.f32.xlu0 %v1457_v27 }
 0x7bd   : > { %1514 = vrot.lane.b32.xlu0 %v3206_v25, %s2986_s18 }
 0x7c1   : > { %1564 = vrot.lane.b32.xlu0 %v3203_v21, %s2988_s19 }
 0x828   : > { %v1456_v28 = vpop.xlane.xlu0 %1455 }
 0x829   : > { %2890 = vrcp.f32 %v1456_v28 }
 0x830   : > { %v1459_v29 = vpop.xlane.xlu0 %1458 }
 0x831   : > { %2892 = vrcp.f32 %v1459_v29  ;;  %v2858_v29 = vld [vmem:[%s3499_s30 + $0x8] sm:$0xff]  }
 0x834   : > { %v1515_v30 = vpop.permute.xlu0 %1514 }
 0x835   : > { %v1520_v31 = vsel %vm1026_vm6, %v1515_v30, 0  ;;  %v2859_v30 = vld [vmem:[%s3499_s30] sm:$0xff]  }
 0x836   : > { %v2891_v32 = vpop.eup %2890  ;;  %2732 = vmatpush3.bf16.msra.mxu0 %v1520_v31 }
 0x837   : > { %v1462_v33 = vmul.f32 %v2891_v32, %v2887_v23  ;;  %2743 = vmatprep.subr.bf16.mxu0 %v2977_v12 }
 0x838   : > { %v1565_v41 = vpop.permute.xlu0 %1564 }
 0x839   : > { %v1464_v35 = vpack.c.bf16 %v1462_v33, %v1462_v33 }
 0x83b   : > { %2728 = vmatmul.mubr.msk.bf16.vlgmr.msra.gmra.mxu1 %vm902_vm5, %v1464_v35 }
 0x83c   : > { %2738 = vmatpush3.bf16.xpose.msra.mxu1 %v1572_v36  ;;  %2739 = vmatprep.mubr.msk.bf16.mxu1 %vm2978_vm3, %v2977_v12 }
 0x83d   : > { %2749 = vmatprep.subr.bf16.mxu1 %v2977_v12 }
 0x83e   : > { %v2893_v37 = vpop.eup %2892 }
 0x83f   : > { %v1463_v38 = vmul.f32 %v2893_v37, %v2889_v26 }
 0x841   : > { %v1465_v40 = vpack.c.bf16 %v1463_v38, %v1463_v38 }
 0x843   : > { %2734 = vmatmul.mubr.msk.bf16.vlgmr.msra.gmra.mxu0 %vm902_vm5, %v1465_v40  ;;  %2740 = vmatmul.mubr.msk.bf16.vlgmr.msra.gmra.mxu1 %vm902_vm5, %v1565_v41 }
 0x844   : > { %2744 = vmatpush3.bf16.xpose.msra.mxu0 %v1622_v42  ;;  %2745 = vmatprep.mubr.msk.bf16.mxu0 %vm2978_vm3, %v2977_v12 }
 0x845   : > { %2755 = vmatprep.subr.bf16.mxu0 %v2977_v12  ;;  %2751 = vmatprep.mubr.msk.bf16.mxu1 %vm2978_vm3, %v2977_v12 }
 0x84b   : > { %2746 = vmatmul.mubr.msk.bf16.vlgmr.msra.gmra.mxu0 %vm902_vm5, %v1615_v43 }
 0x84c   : > { %2757 = vmatprep.mubr.msk.bf16.mxu0 %vm2978_vm3, %v2977_v12 }
 0x8fb   : > { %v1508_v44 = vpop.f32.mrf.mxu1 }
 0x8fc   : > { %v1562_v17 = vpack.c.bf16 %v1508_v44, %v1508_v44 }
 0x8fd   : > { %v2729_v45 = vpop.f32.mrf.mxu1 }
 0x8fe   : > { %v1118_v45 = vpack.c.bf16 %v3251_v4, %v3251_v4  ;;  %v2561_v4 = vld [vmem:[%s719_s27] ss:$0 sm:$0xff] }
 0x8ff   : > { %v1511_v46 = vpop.f32.mrf.mxu1 }
 0x900   : > { %v1119_v46 = vpack.c.bf16 %v3253_v8, %v3253_v8 }
 0x901   : > { %v2730_v47 = vpop.f32.mrf.mxu1 }
 0x903   : > { %v1556_v48 = vpop.f32.mrf.mxu0  ;;  %v1608_v49 = vpop.f32.mrf.mxu1 }
 0x904   : > { %v1664_v50 = vsel %vm902_vm5, %v1608_v49, -inf  ;;  %v1563_v2 = vpack.c.bf16 %v1556_v48, %v1556_v48 }
 0x905   : > { %1665 = vmax.xlane.f32.xlu0 %v1664_v50  ;;  %v2735_v51 = vpop.f32.mrf.mxu0  ;;  %v2741_v52 = vpop.f32.mrf.mxu1 }
 0x907   : > { %v1559_v53 = vpop.f32.mrf.mxu0  ;;  %v1611_v54 = vpop.f32.mrf.mxu1 }
 0x909   : > { %v2736_v56 = vpop.f32.mrf.mxu0  ;;  %v2742_v57 = vpop.f32.mrf.mxu1 }
 0x90b   : > { %v1658_v58 = vpop.f32.mrf.mxu0 }
 0x90c   : > { %v1667_v60 = vsel %vm902_vm5, %v1658_v58, -inf }
 0x90d   : > { %1668 = vmax.xlane.f32.xlu1 %v1667_v60  ;;  %v2747_v61 = vpop.f32.mrf.mxu0 }
 0x90f   : > { %v1661_v62 = vpop.f32.mrf.mxu0 }
 0x911   : > { %v2748_v63 = vpop.f32.mrf.mxu0 }
 0x91e   : > { %1688 = vrot.lane.b32.xlu1 %v3203_v21, %s2989_s20 }
 0x922   : > { %1788 = vrot.lane.b32.xlu1 %v1340_v0, %s2990_s21 }
 0x926   : > { %1790 = vrot.lane.b32.xlu1 %v1341_v1, %s2990_s21 }
 0x92a   : > { %1796 = vrot.lane.b32.xlu1 %v1563_v2, %s2991_s5 }
 0x98e   : > { %v1666_v3 = vpop.xlane.xlu0 %1665 }
 0x98f   : > { %v1670_v5 = vsub.f32 %v1608_v49, %v1666_v3 }
 0x991   : > { %v1672_v6 = vmul.f32 1.442695, %v1670_v5 }
 0x993   : > { %2894 = vpow2.f32 %v1672_v6 }
 0x996   : > { %v1669_v7 = vpop.xlane.xlu1 %1668 }
 0x997   : > { %v1671_v9 = vsub.f32 %v1658_v58, %v1669_v7 }
 0x999   : > { %v1674_v10 = vmul.f32 1.442695, %v1671_v9 }
 0x99a   : > { %v1689_v21 = vpop.permute.xlu1 %1688 }
 0x99b   : > { %2896 = vpow2.f32 %v1674_v10  ;;  %v1694_v55 = vsel %vm1026_vm6, %v1689_v21, 0 }
 0x99c   : > { %2750 = vmatpush3.bf16.msra.mxu1 %v1694_v55 }
 0x99d   : > { %2761 = vmatprep.subr.bf16.mxu1 %v2977_v12 }
 0x99e   : > { %v1789_v41 = vpop.permute.xlu1 %1788 }
 0x99f   : > { %v1806_v48 = vsel %vm902_vm5, %v1118_v45, %v1789_v41  ;;  %v2568_v41 = vld [vmem:[%s739_s28] ss:$0 sm:$0xff] }
 0x9a0   : > { %v2895_v11 = vpop.eup %2894 }
 0x9a1   : > { %v1676_v59 = vsel %vm902_vm5, %v2895_v11, 0.0 }
 0x9a2   : > { %1677 = vadd.xlane.f32.xlu0 %v1676_v59  ;;  %v1791_v42 = vpop.permute.xlu1 %1790  ;;  %v2861_v59 = vld [vmem:[%s3153_s16] sm:$0xff]  }
 0x9a3   : > { %v1809_v49 = vsel %vm902_vm5, %v1119_v46, %v1791_v42 }
 0x9a6   : > { %v1797_v44 = vpop.permute.xlu1 %1796 }
 0x9a7   : > { %v1814_v50 = vsel %vm1810_vm7, %v1809_v49, %v1797_v44 }
 0x9a8   : > { %v2897_v13 = vpop.eup %2896 }
 0x9a9   : > { %v1679_v16 = vsel %vm902_vm5, %v2897_v13, 0.0 }
 0x9aa   : > { %1680 = vadd.xlane.f32.xlu0 %v1679_v16 }
 0x9c0   : > { %1736 = vrot.lane.b32.xlu0 %v3206_v25, %s2989_s20 }
 0x9c4   : > { %1794 = vrot.lane.b32.xlu0 %v1562_v17, %s2991_s5 }
 0xa2b   : > { %v1678_v18 = vpop.xlane.xlu0 %1677 }
 0xa2c   : > { %2898 = vrcp.f32 %v1678_v18 }
 0xa33   : > { %v1681_v19 = vpop.xlane.xlu0 %1680 }
 0xa34   : > { %2900 = vrcp.f32 %v1681_v19 }
 0xa37   : > { %v1737_v20 = vpop.permute.xlu0 %1736 }
 0xa38   : > { %v1742_v22 = vsel %vm1026_vm6, %v1737_v20, 0 }
 0xa39   : > { %v2899_v23 = vpop.eup %2898  ;;  %2756 = vmatpush3.bf16.msra.mxu0 %v1742_v22 }
 0xa3a   : > { %v1684_v24 = vmul.f32 %v2899_v23, %v2895_v11  ;;  %2769 = vmatprep.subr.bf16.mxu0 %v2977_v12 }
 0xa3b   : > { %v1795_v43 = vpop.permute.xlu0 %1794 }
 0xa3c   : > { %v1686_v26 = vpack.c.bf16 %v1684_v24, %v1684_v24  ;;  %v1812_v51 = vsel %vm1810_vm7, %v1806_v48, %v1795_v43 }
 0xa3e   : > { %2752 = vmatmul.mubr.msk.bf16.vlgmr.msra.gmra.mxu1 %vm902_vm5, %v1686_v26 }
 0xa3f   : > { %2765 = vmatprep.mubr.msk.bf16.mxu1 %vm2978_vm3, %v2977_v12  ;;  %2762 = vmatpush3.bf16.msra.mxu1 %v2858_v29 }
 0xa40   : > { %2763 = vmatprep.subr.bf16.mxu1 %v2977_v12 }
 0xa41   : > { %v2901_v25 = vpop.eup %2900 }
 0xa42   : > { %v1685_v27 = vmul.f32 %v2901_v25, %v2897_v13 }
 0xa43   : > { %2764 = vmatpush3.bf16.msra.mxu1 %v2859_v30 }
 0xa44   : > { %v1687_v28 = vpack.c.bf16 %v1685_v27, %v1685_v27  ;;  %2777 = vmatprep.subr.bf16.mxu1 %v2977_v12 }
 0xa46   : > { %2758 = vmatmul.mubr.msk.bf16.vlgmr.msra.gmra.mxu0 %vm902_vm5, %v1687_v28  ;;  %v2567_v28 = vld [vmem:[%s3501_s22] ss:$0 sm:$0xff] }
 0xa47   : > { %2773 = vmatprep.mubr.msk.bf16.mxu0 %vm2978_vm3, %v2977_v12 }
 0xafe   : > { %v1730_v31 = vpop.f32.mrf.mxu1 }
 0xaff   : > { %v1784_v32 = vpack.c.bf16 %v1730_v31, %v1730_v31 }
 0xb00   : > { %v2753_v33 = vpop.f32.mrf.mxu1 }
 0xb01   : > { %1800 = vrot.lane.b32.xlu0 %v1784_v32, %s2992_s25  ;;  %v2862_v33 = vld [vmem:[%s3163_s1 + $0x38] sm:$0xff]  }
 0xb02   : > { %v1733_v34 = vpop.f32.mrf.mxu1 }
 0xb03   : > { %v2863_v34 = vld [vmem:[%s3163_s1 + $0x30] sm:$0xff]  }
 0xb04   : > { %v2754_v35 = vpop.f32.mrf.mxu1 }
 0xb05   : > { %v2864_v35 = vld [vmem:[%s3163_s1 + $0x28] sm:$0xff]  }
 0xb06   : > { %v1778_v36 = vpop.f32.mrf.mxu0 }
 0xb07   : > { %v1785_v37 = vpack.c.bf16 %v1778_v36, %v1778_v36  ;;  %v2865_v36 = vld [vmem:[%s3163_s1 + $0x20] sm:$0xff]  }
 0xb08   : > { %v2759_v38 = vpop.f32.mrf.mxu0 }
 0xb09   : > { %1802 = vrot.lane.b32.xlu1 %v1785_v37, %s2992_s25  ;;  %v2866_v37 = vld [vmem:[%s3163_s1 + $0x18] sm:$0xff]   ;;  %v2867_v38 = vld [vmem:[%s3163_s1 + $0x10] sm:$0xff]  }
 0xb0a   : > { %v1781_v39 = vpop.f32.mrf.mxu0 }
 0xb0b   : > { %v2868_v39 = vld [vmem:[%s3163_s1 + $0x8] sm:$0xff]  }
 0xb0c   : > { %v2760_v40 = vpop.f32.mrf.mxu0 }
 0xb0d   : > { %v2869_v40 = vld [vmem:[%s3163_s1] sm:$0xff]  }
 0xb73   : > { %v1801_v47 = vpop.permute.xlu0 %1800 }
 0xb74   : > { %v1817_v53 = vsel %vm1815_vm8, %v1812_v51, %v1801_v47 }
 0xb7b   : > { %v1803_v52 = vpop.permute.xlu1 %1802 }
 0xb7c   : > { %v1819_v54 = vsel %vm1815_vm8, %v1814_v50, %v1803_v52 }
 0xb7d   : > { %v2562_v56 = vcombine.low %v1817_v53, %v1819_v54 }
 0xb7f   : > { %2766 = vmatmul.mubr.msk.bf16.vlgmr.msra.gmra.mxu1 %vm849_vm4, %v2562_v56 }
 0xb80   : > { %2793 = vmatprep.mubr.msk.bf16.mxu1 %vm2978_vm3, %v2977_v12  ;;  %2778 = vmatpush3.bf16.msra.mxu1 %v2862_v33 }
 0xb81   : > { %2779 = vmatprep.subr.bf16.mxu1 %v2977_v12 }
 0xb84   : > { %2780 = vmatpush3.bf16.msra.mxu1 %v2863_v34 }
 0xb85   : > { %2781 = vmatprep.subr.bf16.mxu1 %v2977_v12 }
 0xb88   : > { %2782 = vmatpush3.bf16.msra.mxu1 %v2864_v35 }
 0xb89   : > { %2783 = vmatprep.subr.bf16.mxu1 %v2977_v12 }
 0xb8c   : > { %2784 = vmatpush3.bf16.msra.mxu1 %v2865_v36 }
 0xb8d   : > { %2785 = vmatprep.subr.bf16.mxu1 %v2977_v12 }
 0xb90   : > { %2786 = vmatpush3.bf16.msra.mxu1 %v2866_v37  ;;  %v2572_v37 = vld [vmem:[%s747_s4] ss:$0 sm:$0xff] }
 0xb91   : > { %2787 = vmatprep.subr.bf16.mxu1 %v2977_v12 }
 0xb94   : > { %2788 = vmatpush3.bf16.msra.mxu1 %v2867_v38 }
 0xb95   : > { %2789 = vmatprep.subr.bf16.mxu1 %v2977_v12 }
 0xb98   : > { %2790 = vmatpush3.bf16.msra.mxu1 %v2868_v39 }
 0xb99   : > { %2791 = vmatprep.subr.bf16.mxu1 %v2977_v12 }
 0xb9c   : > { %2792 = vmatpush3.bf16.msra.mxu1 %v2869_v40 }
 0xc3f   : > { %v1885_v8 = vpop.f32.mrf.mxu1 }
 0xc40   : > { %v1886_v57 = vadd.f32 %v2561_v4, %v1885_v8 }
 0xc41   : > { %v2767_v58 = vpop.f32.mrf.mxu1 }
 0xc42   : > { %v1892_v60 = vadd.f32 %v1886_v57, %v3185_v14 }
 0xc43   : > { %v1888_v61 = vpop.f32.mrf.mxu1 }
 0xc44   : > { %v1889_v62 = vadd.f32 %v2561_v4, %v1888_v61  ;;  %v1896_v63 = vsel %vm849_vm4, %v1892_v60, 0.0 }
 0xc45   : > { %1897 = vadd.xlane.f32.xlu0 %v1896_v63  ;;  %v2768_v0 = vpop.f32.mrf.mxu1 }
 0xc46   : > { %v1893_v1 = vadd.f32 %v1889_v62, %v3187_v15  ;;  %v2860_v15 = vld [vmem:[%s3153_s16 + $0x8] sm:$0xff]   ;;  %s3500_s16 = scalar_lea.vmem %s3467_s7, %s3113_s0  ;;  %s3502_s0 = sld [smem:[#allocation16_spill]] (!%p2583_p6) }
 0xc47   : > { %2770 = vmatpush3.bf16.msra.mxu0 %v2860_v15  ;;  %v2566_v24 = vld [vmem:[%s3500_s16] ss:$0 sm:$0xff] }
 0xc48   : > { %v1899_v2 = vsel %vm849_vm4, %v1893_v1, 0.0  ;;  %2771 = vmatprep.subr.bf16.mxu0 %v2977_v12 }
 0xc49   : > { %1900 = vadd.xlane.f32.xlu1 %v1899_v2 }
 0xc4b   : > { %2772 = vmatpush3.bf16.msra.mxu0 %v2861_v59 }
 0xcce   : > { %v1898_v3 = vpop.xlane.xlu0 %1897 }
 0xccf   : > { %v1903_v5 = vmul.f32 0.03125, %v1898_v3 }
 0xcd1   : > { %v1905_v6 = vsub.f32 %v1892_v60, %v1903_v5 }
 0xcd2   : > { %v1901_v7 = vpop.xlane.xlu1 %1900 }
 0xcd3   : > { %v1904_v9 = vmul.f32 0.03125, %v1901_v7  ;;  %v1907_v10 = vmul.f32 %v1905_v6, %v1905_v6 }
 0xcd5   : > { %v1906_v14 = vsub.f32 %v1893_v1, %v1904_v9  ;;  %v1909_v21 = vsel %vm849_vm4, %v1907_v10, 0.0 }
 0xcd6   : > { %1910 = vadd.xlane.f32.xlu0 %v1909_v21 }
 0xcd7   : > { %v1908_v55 = vmul.f32 %v1906_v14, %v1906_v14 }
 0xcd9   : > { %v1912_v11 = vsel %vm849_vm4, %v1908_v55, 0.0 }
 0xcda   : > { %1913 = vadd.xlane.f32.xlu0 %v1912_v11 }
 0xd5f   : > { %v1911_v13 = vpop.xlane.xlu0 %1910 }
 0xd60   : > { %v1915_v16 = vmul.f32 0.03125, %v1911_v13 }
 0xd62   : > { %v1917_v17 = vadd.f32 1e-05, %v1915_v16 }
 0xd63   : > { %v1914_v18 = vpop.xlane.xlu0 %1913 }
 0xd64   : > { %2902 = vrsqrt.f32 %v1917_v17  ;;  %v1916_v19 = vmul.f32 0.03125, %v1914_v18 }
 0xd66   : > { %v1918_v20 = vadd.f32 1e-05, %v1916_v19 }
 0xd68   : > { %2904 = vrsqrt.f32 %v1918_v20 }
 0xd71   : > { %v2903_v22 = vpop.eup %2902 }
 0xd72   : > { %v1921_v23 = vmul.f32 %v2903_v22, %v1905_v6 }
 0xd74   : > { %v1929_v27 = vmul.f32 %v2566_v24, %v1921_v23 }
 0xd75   : > { %v2905_v26 = vpop.eup %2904 }
 0xd76   : > { %v1922_v25 = vmul.f32 %v2905_v26, %v1906_v14  ;;  %v3376_v30 = vadd.f32 %v2567_v28, %v1929_v27 }
 0xd78   : > { %v1930_v29 = vmul.f32 %v2566_v24, %v1922_v25 }
 0xd7a   : > { %v3378_v31 = vadd.f32 %v2567_v28, %v1930_v29 }
 0xd7c   : > { %v1939_v32 = vpack.c.bf16 %v3378_v31, %v3376_v30 }
 0xd7e   : > { %2774 = vmatmul.mubr.msk.bf16.vlgmr.msra.gmra.mxu0 %vm849_vm4, %v1939_v32 }
 0xe3e   : > { %v2000_v42 = vpop.f32.mrf.mxu0 }
 0xe3f   : > { %v2001_v43 = vadd.f32 %v2568_v41, %v2000_v42 }
 0xe40   : > { %v2775_v44 = vpop.f32.mrf.mxu0 }
 0xe41   : > { %v2009_v45 = vmul.f32 0.70710677, %v2001_v43  ;;  %v2007_v29 = vmul.f32 0.5, %v2001_v43 }
 0xe42   : > { %v2003_v46 = vpop.f32.mrf.mxu0 }
 0xe43   : > { %v2011_v47 = vand.u32 2147483647, %v2009_v45  ;;  %v2004_v48 = vadd.f32 %v2568_v41, %v2003_v46  ;;  %vm2049_vm9 = vcmp.ge.f32.partialorder %v2009_v45, 0.0 }
 0xe44   : > { %v2776_v49 = vpop.f32.mrf.mxu0 }
 0xe45   : > { %v2013_v50 = vmul.f32 0.3275911, %v2011_v47  ;;  %v2010_v51 = vmul.f32 0.70710677, %v2004_v48  ;;  %v2037_v56 = vsub.f32 0.0, %v2011_v47  ;;  %v2008_v32 = vmul.f32 0.5, %v2004_v48 }
 0xe47   : > { %v2015_v52 = vadd.f32 1.0, %v2013_v50  ;;  %v2012_v53 = vand.u32 2147483647, %v2010_v51  ;;  %v2039_v4 = vmul.f32 %v2037_v56, %v2011_v47  ;;  %vm2050_vm10 = vcmp.ge.f32.partialorder %v2010_v51, 0.0 }
 0xe49   : > { %2906 = vrcp.f32 %v2015_v52  ;;  %v2014_v12 = vmul.f32 0.3275911, %v2012_v53  ;;  %v2038_v8 = vsub.f32 0.0, %v2012_v53  ;;  %v2041_v60 = vmul.f32 1.442695, %v2039_v4 }
 0xe4b   : > { %v2016_v54 = vadd.f32 1.0, %v2014_v12  ;;  %v2040_v61 = vmul.f32 %v2038_v8, %v2012_v53 }
 0xe4d   : > { %2908 = vrcp.f32 %v2016_v54  ;;  %v2043_v2 = vmul.f32 1.442695, %v2040_v61 }
 0xe4e   : > { %2910 = vpow2.f32 %v2041_v60 }
 0xe4f   : > { %2912 = vpow2.f32 %v2043_v2 }
 0xe56   : > { %v2907_v57 = vpop.eup %2906 }
 0xe57   : > { %v2019_v58 = vmul.f32 1.0614054, %v2907_v57 }
 0xe59   : > { %v2021_v62 = vadd.f32 -1.4531521, %v2019_v58 }
 0xe5a   : > { %v2909_v63 = vpop.eup %2908 }
 0xe5b   : > { %v2023_v0 = vmul.f32 %v2907_v57, %v2021_v62  ;;  %v2020_v1 = vmul.f32 1.0614054, %v2909_v63  ;;  %v2911_v13 = vpop.eup %2910  ;;  %v2581_v62 = vld [vmem:[%s728_s3] ss:$0 sm:$0xff] }
 0xe5c   : > { %v2913_v20 = vpop.eup %2912 }
 0xe5d   : > { %v2025_v3 = vadd.f32 1.4214138, %v2023_v0  ;;  %v2022_v5 = vadd.f32 -1.4531521, %v2020_v1  ;;  %v2582_v0 = vld [vmem:[%s731_s24] ss:$0 sm:$0xff] }
 0xe5f   : > { %v2027_v6 = vmul.f32 %v2907_v57, %v2025_v3  ;;  %v2024_v7 = vmul.f32 %v2909_v63, %v2022_v5 }
 0xe61   : > { %v2029_v9 = vadd.f32 -0.28449672, %v2027_v6  ;;  %v2026_v10 = vadd.f32 1.4214138, %v2024_v7 }
 0xe63   : > { %v2031_v14 = vmul.f32 %v2907_v57, %v2029_v9  ;;  %v2028_v21 = vmul.f32 %v2909_v63, %v2026_v10 }
 0xe65   : > { %v2033_v55 = vadd.f32 0.2548296, %v2031_v14  ;;  %v2030_v11 = vadd.f32 -0.28449672, %v2028_v21 }
 0xe67   : > { %v2035_v15 = vmul.f32 %v2907_v57, %v2033_v55  ;;  %v2032_v59 = vmul.f32 %v2909_v63, %v2030_v11 }
 0xe69   : > { %v2045_v16 = vmul.f32 %v2911_v13, %v2035_v15  ;;  %v2034_v17 = vadd.f32 0.2548296, %v2032_v59 }
 0xe6b   : > { %v2047_v18 = vsub.f32 1.0, %v2045_v16  ;;  %v2036_v19 = vmul.f32 %v2909_v63, %v2034_v17 }
 0xe6d   : > { %v2051_v22 = vsub.f32 0.0, %v2047_v18  ;;  %v2046_v23 = vmul.f32 %v2913_v20, %v2036_v19 }
 0xe6f   : > { %v2053_v24 = vsel %vm2049_vm9, %v2047_v18, %v2051_v22  ;;  %v2048_v26 = vsub.f32 1.0, %v2046_v23 }
 0xe70   : > { %v2055_v27 = vadd.f32 1.0, %v2053_v24 }
 0xe71   : > { %v2052_v25 = vsub.f32 0.0, %v2048_v26 }
 0xe72   : > { %v2057_v34 = vmul.f32 %v2055_v27, %v2007_v29 }
 0xe73   : > { %v2054_v28 = vsel %vm2050_vm10, %v2048_v26, %v2052_v25 }
 0xe74   : > { %v2056_v33 = vadd.f32 1.0, %v2054_v28 }
 0xe76   : > { %v2058_v35 = vmul.f32 %v2056_v33, %v2008_v32 }
 0xe78   : > { %v2059_v36 = vpack.c.bf16 %v2058_v35, %v2057_v34 }
 0xe7a   : > { %2794 = vmatmul.mubr.bf16.vlgmr.msra.gmra.mxu1 %v2059_v36 }
 0xf3a   : > { %v2165_v38 = vpop.f32.mrf.mxu1 }
 0xf3b   : > { %v2166_v39 = vadd.f32 %v2572_v37, %v2165_v38 }
 0xf3c   : > { %v2795_v40 = vpop.f32.mrf.mxu1 }
 0xf3d   : > { %v2172_v41 = vadd.f32 %v2166_v39, %v3376_v30 }
 0xf3e   : > { %v2168_v42 = vpop.f32.mrf.mxu1 }
 0xf3f   : > { %v2169_v44 = vadd.f32 %v2572_v37, %v2168_v42  ;;  %v2176_v43 = vsel %vm849_vm4, %v2172_v41, 0.0 }
 0xf40   : > { %2177 = vadd.xlane.f32.xlu1 %v2176_v43  ;;  %v2796_v45 = vpop.f32.mrf.mxu1 }
 0xf41   : > { %v2173_v46 = vadd.f32 %v2169_v44, %v3378_v31 }
 0xf43   : > { %v2179_v47 = vsel %vm849_vm4, %v2173_v46, 0.0 }
 0xf44   : > { %2180 = vadd.xlane.f32.xlu0 %v2179_v47 }
 0xfc9   : > { %v2178_v48 = vpop.xlane.xlu1 %2177 }
 0xfca   : > { %v2182_v49 = vmul.f32 0.03125, %v2178_v48 }
 0xfcc   : > { %v2184_v50 = vsub.f32 %v2172_v41, %v2182_v49 }
 0xfcd   : > { %v2181_v51 = vpop.xlane.xlu0 %2180 }
 0xfce   : > { %v2183_v52 = vmul.f32 0.03125, %v2181_v51  ;;  %v2186_v53 = vmul.f32 %v2184_v50, %v2184_v50 }
 0xfd0   : > { %v2185_v12 = vsub.f32 %v2173_v46, %v2183_v52  ;;  %v2188_v30 = vsel %vm849_vm4, %v2186_v53, 0.0 }
 0xfd1   : > { %2189 = vadd.xlane.f32.xlu1 %v2188_v30 }
 0xfd2   : > { %v2187_v54 = vmul.f32 %v2185_v12, %v2185_v12 }
 0xfd4   : > { %v2191_v56 = vsel %vm849_vm4, %v2187_v54, 0.0 }
 0xfd5   : > { %2192 = vadd.xlane.f32.xlu0 %v2191_v56 }
0x105a   : > { %v2190_v31 = vpop.xlane.xlu1 %2189 }
0x105b   : > { %v2194_v4 = vmul.f32 0.03125, %v2190_v31 }
0x105d   : > { %v2196_v8 = vadd.f32 1e-05, %v2194_v4 }
0x105e   : > { %v2193_v57 = vpop.xlane.xlu0 %2192 }
0x105f   : > { %2914 = vrsqrt.f32 %v2196_v8  ;;  %v2195_v58 = vmul.f32 0.03125, %v2193_v57 }
0x1061   : > { %v2197_v60 = vadd.f32 1e-05, %v2195_v58 }
0x1063   : > { %2916 = vrsqrt.f32 %v2197_v60 }
0x106c   : > { %v2915_v61 = vpop.eup %2914 }
0x106d   : > { %v2200_v63 = vmul.f32 %v2915_v61, %v2184_v50 }
0x106f   : > { %v2208_v1 = vmul.f32 %v2581_v62, %v2200_v63 }
0x1070   : > { %v2917_v2 = vpop.eup %2916 }
0x1071   : > { %v2216_v3 = vadd.f32 %v2582_v0, %v2208_v1  ;;  %v2201_v5 = vmul.f32 %v2917_v2, %v2185_v12 }
0x1073   : > { %2218 = vst.msk [vmem:[#allocation2] sm:$0xff] %vm849_vm4, %v2216_v3  ;;  %v2209_v6 = vmul.f32 %v2581_v62, %v2201_v5  ;;  %2223 = sbr.rel (%p2583_p6) target bundleno = 4463 (0x116f), region = 96 }
0x1075   : > { %v2217_v7 = vadd.f32 %v2582_v0, %v2209_v6 }
0x1077   : > { %2219 = vst.msk [vmem:[#allocation2 + $0x8] sm:$0xff] %vm849_vm4, %v2217_v7 }
0x1078   : > { %v2224_v9 = vsel %vm849_vm4, %v2216_v3, 0.0  ;;  %v2231_v10 = vsel %vm849_vm4, %v2217_v7, 0.0  ;;  %v2993_v14 = vmov 0.0   ;;  %v2242_v11 = vld [vmem:[#allocation3] sm:$0x1]  ;;  %vm2994_vm11 = vmmov 0  }
0x1079   : > { %2797 = vmatprep.subr.mxu0 %v2993_v14  ;;  %v2225_v21 = vrot.slane %v2224_v9, 4  ;;  %v2232_v55 = vrot.slane %v2231_v10, 4  ;;  %2799 = vmatprep.mubr.msk.f32.mxu0 %vm2994_vm11, %v2993_v14  ;;  %v2995_v15 = vmov 0   ;;  %vm2254_vm12 = vcmask 1041409   ;;  %v2241_v28 = vld [vmem:[%s3502_s0] sm:$0x1] }
0x107a   : > { %2918 = vset.pattern.permute.xlu0 %v2995_v15  ;;  %v2248_v29 = vlaneseq  ;;  %vm2337_vm13 = vcmask 8192  }
0x107b   : > { %v2226_v59 = vadd.f32 %v2225_v21, %v2224_v9  ;;  %v2233_v13 = vadd.f32 %v2232_v55, %v2231_v10  ;;  %2245 = vperm.xlu0 %2918, %v2242_v11  }
0x107c   : > { %v2249_v32 = vshrl.u32 %v2248_v29, 7 }
0x107d   : > { %v2227_v16 = vrot.slane %v2226_v59, 2  ;;  %v2234_v17 = vrot.slane %v2233_v13, 2 }
0x107e   : > { %v2250_v33 = vsub.s32 0, %v2249_v32 }
0x107f   : > { %v2228_v18 = vadd.f32 %v2227_v16, %v2226_v59  ;;  %v2235_v19 = vadd.f32 %v2234_v17, %v2233_v13 }
0x1081   : > { %v2229_v20 = vrot.slane %v2228_v18, 1  ;;  %v2236_v22 = vrot.slane %v2235_v19, 1 }
0x1083   : > { %v2230_v23 = vadd.f32 %v2229_v20, %v2228_v18  ;;  %v2237_v24 = vadd.f32 %v2236_v22, %v2235_v19 }
0x1085   : > { %v2239_v26 = vmul.f32 0.125, %v2230_v23  ;;  %v2240_v25 = vmul.f32 0.125, %v2237_v24 }
0x1087   : > { %v2255_v27 = vsel %vm2254_vm12, %v2240_v25, %v2239_v26 }
0x1088   : > { %2798 = vmatpush3.xpose.msk.msra.mxu0 %vm849_vm4, %v2255_v27 }
0x108b   : > { %2800 = vmatmul.mubr.msk.f32.vlgmr.msra.gmra.mxu0 %vm849_vm4, %v2241_v28 }
0x10f6   : > { %v2246_v34 = vpop.permute.xlu0 %2245 }
0x10f7   : > { %v2251_v35 = vrot.slane %v2246_v34, %v2250_v33 }
0x114b   : > { %v2327_v36 = vpop.f32.mrf.mxu0 }
0x114c   : > { %v2328_v37 = vadd.f32 %v2327_v36, %v2251_v35 }
0x114d   : > { %v2801_v38 = vpop.f32.mrf.mxu0 }
0x114e   : > { %v2586_v39 = vmul.f32 -1.442695, %v2328_v37 }
0x1150   : > { %2919 = vpow2.f32 %v2586_v39 }
0x115d   : > { %v2920_v40 = vpop.eup %2919 }
0x115e   : > { %v2334_v41 = vadd.f32 1.0, %v2920_v40 }
0x1160   : > { %2921 = vrcp.f32 %v2334_v41 }
0x116d   : > { %v2922_v42 = vpop.eup %2921 }
0x116e   : > { %2338 = vst.msk [vmem:[#allocation4] sm:$0x1] %vm2337_vm13, %v2922_v42 }
0x116f PF: > { %s3503_s24 = sld [smem:[#allocation8_spill]]  ;;  %s2996_s29 = smov [#allocation4]  }
0x1170   : > { %s2348_s27 = sshll.u32 %s2996_s29, 4  ;;  %s2349_s27 = int_to_ptr.vmem [resolvable:$true] %s2348_s27 }
0x1171   : > { %s2923_s17 = scalar_lea.vmem %s2349_s27, 16  ;;  %s2929_s16 = scalar_lea.vmem %s2349_s27, 32 }
0x1172   : > { %p2924_p8 = scmp.ne.s32.totalorder %s2349_s27, %s2923_s17  ;;  %p2930_p11 = scmp.lt.s32.totalorder %s2349_s27, %s2349_s27 }
0x1173   : > { %p2931_p12 = scmp.lt.s32.totalorder %s2929_s16, %s2923_s17 }
0x1175   : > { %s3504_s25 = sadd.s32 4294967295, %s3503_s24   ;;  %p2932_p13 = por %p2931_p12, %p2930_p11 }
0x1176   : > { %p3436_p7 = scmp.eq.s32.totalorder %s3504_s25, 1 }
0x1178   : > { %p2925_p9 = pnand %p2924_p8, %p3436_p7 }
0x117a   : > { %p2926_p10 = pneg %p2925_p9 }
0x117c   : > { %p2933_p0 = pnand %p2932_p13, %p2926_p10 }
0x117e   : > { %2936 = shalt.err (!%p2933_p0)
}
0x117f   : > { %s3506_s22 = sld [smem:[#allocation17_spill]] }
0x1185   : > { %2803 = dma.vmem_to_hbm [thread:$0]  (%p3436_p7), %s2349_s27, 16, %s3506_s22, [#allocation5]  }
0x1186   : > { %2960 = dma.done.wait (%p3436_p7), [#allocation5], 16  }
0x1187   : > { %2962 = vsyncadd (%p3436_p7), [#allocation5], 4294967280 }
0x1188 PF: > { %s3507_s19 = sld [smem:[#allocation8_spill]] }
0x1189   : > { %s3508_s26 = sld [smem:[#allocation7_spill]] }
0x118a   : > { %s3509_s27 = sld [smem:[#allocation9_spill]] }
0x118e   : > { %s30_s28 = sadd.s32 1, %s3507_s19  }
0x118f   : > { %p27_p1 = scmp.ge.s32.totalorder %s30_s28, 4  }
0x1191   :  { %29 = sbr.rel (!%p27_p1) target bundleno = 10 (0xa), region = 160 }
0x1196   :  { %2361 = vsyncpa [#allocation5], 1 }
0x1197   :  { %2363 = vsyncpa [#allocation5 + $0x1], 1 }

</bundles_post_ra>
